<compile_context>
chip_gen: v5e
topology: v5e:2x2
jax: 0.10.0
libtpu: 0.0.40
codegen_flags: <defaults>
</compile_context>

<pallas_src>
import functools

import jax
import jax.numpy as jnp
from jax import lax
from jax.experimental import pallas as pl
from jax.experimental.pallas import tpu as pltpu


# ---------------------------------------------------------------------------
# Kernel
# ---------------------------------------------------------------------------
def pse_basic_block_kernel(
    x_ref,       # (1, Cin, HW)  input image: channels on sublanes, h*W+w on lanes
    masks_ref,   # (9, 1, HW)    per-tap zero-padding border masks (0/1)
    wc1_ref,     # (C, 9*Cin)    conv1 weights, tap-major K, bn1 scale folded in
    bn1b_ref,    # (C, HW)       bn1 bias (lane-broadcast)
    wc2_ref,     # (C, 9*C)      conv2 weights, bn2 scale folded in
    bn2b_ref,    # (C, HW)       bn2 bias
    sew1_ref,    # (Cr, HW)      SE squeeze weight (scalar per row, lane-broadcast)
    seb1_ref,    # (Cr, HW)      SE squeeze bias
    sew2_ref,    # (Cr, C, HW)   SE expand weight (per-channel, lane-broadcast)
    seb2_ref,    # (C, HW)       SE expand bias
    out_ref,     # (1, C, HW)
    *, H, W,
):
    HW = H * W
    x = x_ref[0]                                     # (Cin, HW) f32

    def conv3x3(inp, w_ref):
        # 3x3 conv, padding=1.  The 9 taps are lane-rolls of the flattened (h*W + w)
        # axis; wrap-around / zero-padding entries are killed by the precomputed
        # border masks (shared by both convs).  The channel/tap contraction is a
        # single K = 9*Cin MXU matmul against the compact (C, 9*Cin) weight.
        taps = []
        for t in range(9):
            dy, dx = t // 3 - 1, t % 3 - 1
            d = dy * W + dx
            sh = inp if d == 0 else pltpu.roll(inp, shift=(-d) % HW, axis=1)
            taps.append(sh * masks_ref[t])           # (Cin, HW) * (1, HW)
        xs = jnp.concatenate(taps, axis=0)           # (9*Cin, HW)
        return jnp.dot(w_ref[...], xs, preferred_element_type=jnp.float32)

    # conv1 -> bn1 (scale folded into the weights, bias here) -> relu
    out1 = jnp.maximum(conv3x3(x, wc1_ref) + bn1b_ref[...], 0.0)
    # conv2 -> bn2
    out2 = conv3x3(out1, wc2_ref) + bn2b_ref[...]

    # ---- PSE module ----
    # Positional average pooling: per-(h, w) mean over channels = cross-sublane mean.
    pap = jnp.mean(out2, axis=0, keepdims=True)      # (1, HW)

    # Tiny SE bottleneck (1 -> Cr -> C, Cr = C // reduction) as VPU broadcast FMAs.
    cr = sew1_ref.shape[0]
    logits = seb2_ref[...]                           # (C, HW)
    for j in range(cr):
        hid = jnp.maximum(pap * sew1_ref[j:j + 1, :] + seb1_ref[j:j + 1, :], 0.0)
        logits = logits + hid * sew2_ref[j]          # (1,HW) x (C,HW) sublane-broadcast
    gate = jax.nn.sigmoid(logits)                    # EUP sigmoid

    # gate * out2, residual add (downsample is None => Cin == C), final relu.
    out_ref[0] = jnp.maximum(out2 * gate + x, 0.0)


# ---------------------------------------------------------------------------
# Wrapper
# ---------------------------------------------------------------------------
@jax.jit
def pse_basic_block(x_nchw, kp):
    """x_nchw: (N, Cin, H, W) float32; kp: kernel-ready params from prepare_params()."""
    N, Cin, H, W = x_nchw.shape
    HW = H * W
    C = kp["bn1b"].shape[0]
    cr = kp["sew1"].shape[0]

    # NCHW -> (N, Cin, H*W): a pure reshape (no transpose); spatial dim is lane-dense.
    x_flat = x_nchw.reshape(N, Cin, HW).astype(jnp.float32)

    kernel = functools.partial(pse_basic_block_kernel, H=H, W=W)

    def const_spec(shape):
        return pl.BlockSpec(shape, lambda n, _z=(0,) * len(shape): _z)

    out_flat = pl.pallas_call(
        kernel,
        out_shape=jax.ShapeDtypeStruct((N, C, HW), jnp.float32),
        grid=(N,),
        in_specs=[
            pl.BlockSpec((1, Cin, HW), lambda n: (n, 0, 0)),
            const_spec((9, 1, HW)),
            const_spec((C, 9 * Cin)),
            const_spec((C, HW)),
            const_spec((C, 9 * C)),
            const_spec((C, HW)),
            const_spec((cr, HW)),
            const_spec((cr, HW)),
            const_spec((cr, C, HW)),
            const_spec((C, HW)),
        ],
        out_specs=pl.BlockSpec((1, C, HW), lambda n: (n, 0, 0)),
        compiler_params=pltpu.CompilerParams(
            dimension_semantics=("parallel",),
        ),
    )(x_flat, kp["masks"], kp["w1"], kp["bn1b"], kp["w2"], kp["bn2b"],
      kp["sew1"], kp["seb1"], kp["sew2"], kp["seb2"])
    return out_flat.reshape(N, C, H, W)


# ---------------------------------------------------------------------------
# Parameter construction / preparation
# ---------------------------------------------------------------------------
def init_params(key, inplanes, planes, reduction=16, eps=1e-5):
    """Deterministic synthetic parameters matching PSEBasicBlock.__init__ shapes."""
    cr = planes // reduction
    keys = jax.random.split(key, 6)

    # conv weights in (ky, kx, Cin, Cout) layout.
    w1 = 0.1 * jax.random.normal(keys[0], (3, 3, inplanes, planes), jnp.float32)
    w2 = 0.1 * jax.random.normal(keys[1], (3, 3, planes, planes), jnp.float32)

    # BatchNorm2d default init (gamma=1, beta=0, mean=0, var=1), folded for inference.
    gamma = jnp.ones((planes,), jnp.float32)
    beta = jnp.zeros((planes,), jnp.float32)
    r_mean = jnp.zeros((planes,), jnp.float32)
    r_var = jnp.ones((planes,), jnp.float32)
    scale = gamma / jnp.sqrt(r_var + eps)
    bias = beta - r_mean * scale

    # PSEModule 1x1 convs (with bias): 1 -> Cr -> C.
    se_w1 = 0.1 * jax.random.normal(keys[2], (cr,), jnp.float32)
    se_b1 = 0.01 * jax.random.normal(keys[3], (cr,), jnp.float32)
    se_w2 = 0.1 * jax.random.normal(keys[4], (cr, planes), jnp.float32)
    se_b2 = 0.01 * jax.random.normal(keys[5], (planes,), jnp.float32)

    return {
        "w1": w1, "bn1_scale": scale, "bn1_bias": bias,
        "w2": w2, "bn2_scale": scale, "bn2_bias": bias,
        "se_w1": se_w1, "se_b1": se_b1, "se_w2": se_w2, "se_b2": se_b2,
    }


def prepare_params(params, H, W):
    """One-time (offline) repack of the weights into the compact kernel layout."""
    w1 = params["w1"]                       # (3, 3, Cin, C)  HWIO
    w2 = params["w2"]
    Cin, C = w1.shape[2], w1.shape[3]
    cr = params["se_w1"].shape[0]
    HW = H * W

    def fold(wconv, scale):
        # (3, 3, kin, kout) -> (kout, 9*kin), tap-major columns (t = ky*3 + kx),
        # with the inference-mode BN scale folded into the output-channel rows.
        kin, kout = wconv.shape[2], wconv.shape[3]
        wt = jnp.transpose(wconv, (3, 0, 1, 2)).reshape(kout, 9 * kin)
        return (wt * scale[:, None]).astype(jnp.float32)

    # Per-tap border masks for the padding=1 conv (pure structure, 9*HW floats).
    hh = jnp.arange(HW, dtype=jnp.int32) // W
    ww = jnp.arange(HW, dtype=jnp.int32) % W
    masks = []
    for ky in range(3):
        for kx in range(3):
            dy, dx = ky - 1, kx - 1
            ok = (hh + dy >= 0) & (hh + dy < H) & (ww + dx >= 0) & (ww + dx < W)
            masks.append(ok.astype(jnp.float32))
    masks = jnp.stack(masks, axis=0).reshape(9, 1, HW)

    def bcast_rows(v):                      # (K,) -> (K, HW) lane-broadcast
        return jnp.broadcast_to(v[:, None], (v.shape[0], HW)).astype(jnp.float32)

    return {
        "masks": masks,
        "w1": fold(w1, params["bn1_scale"]),
        "bn1b": bcast_rows(params["bn1_bias"]),
        "w2": fold(w2, params["bn2_scale"]),
        "bn2b": bcast_rows(params["bn2_bias"]),
        "sew1": bcast_rows(params["se_w1"]),
        "seb1": bcast_rows(params["se_b1"]),
        "sew2": jnp.broadcast_to(params["se_w2"][:, :, None], (cr, C, HW)).astype(jnp.float32),
        "seb2": bcast_rows(params["se_b2"]),
    }


# ---------------------------------------------------------------------------
# Pure-JAX reference (module semantics) for validation
# ---------------------------------------------------------------------------
def pse_basic_block_ref(x, params):
    dn = ("NCHW", "HWIO", "NCHW")
    out = lax.conv_general_dilated(x, params["w1"], (1, 1), ((1, 1), (1, 1)),
                                   dimension_numbers=dn)
    out = out * params["bn1_scale"][None, :, None, None] + params["bn1_bias"][None, :, None, None]
    out = jnp.maximum(out, 0.0)
    out = lax.conv_general_dilated(out, params["w2"], (1, 1), ((1, 1), (1, 1)),
                                   dimension_numbers=dn)
    out = out * params["bn2_scale"][None, :, None, None] + params["bn2_bias"][None, :, None, None]
    pap = jnp.mean(out, axis=1, keepdims=True)                                 # (N,1,H,W)
    hid = jnp.maximum(pap * params["se_w1"][None, :, None, None]
                      + params["se_b1"][None, :, None, None], 0.0)             # (N,Cr,H,W)
    logits = jnp.einsum("njhw,jc->nchw", hid, params["se_w2"]) \
        + params["se_b2"][None, :, None, None]
    out = out * jax.nn.sigmoid(logits)
    return jnp.maximum(out + x, 0.0)


if __name__ == "__main__":
    # N=2, inplanes=planes=32, H=W=16, reduction=16 (SE bottleneck = 32//16 = 2).
    N, C, H, W = 2, 32, 16, 16
    key = jax.random.PRNGKey(0)
    kx_key, kp_key = jax.random.split(key)
    x = jax.random.normal(kx_key, (N, C, H, W), jnp.float32)

    params = init_params(kp_key, inplanes=C, planes=C, reduction=16)
    kparams = prepare_params(params, H, W)          # done once, outside the call path

    out = pse_basic_block(x, kparams)
    out = jax.block_until_ready(out)
    assert out.shape == (N, C, H, W)

    ref = pse_basic_block_ref(x, params)
    err = float(jnp.max(jnp.abs(out - ref)))
    assert err < 5e-3, f"max abs err vs reference: {err}"
    print("KERNEL_OK")
</pallas_src>

<mosaic_0001>
module attributes {stable_mosaic.version = 11 : i64} {
  func.func @pse_basic_block_kernel(%arg0: i32, %arg1: memref<1x32x256xf32, #tpu.memory_space<vmem>>, %arg2: memref<9x1x256xf32, #tpu.memory_space<vmem>>, %arg3: memref<32x288xf32, #tpu.memory_space<vmem>>, %arg4: memref<32x256xf32, #tpu.memory_space<vmem>>, %arg5: memref<32x288xf32, #tpu.memory_space<vmem>>, %arg6: memref<32x256xf32, #tpu.memory_space<vmem>>, %arg7: memref<2x256xf32, #tpu.memory_space<vmem>>, %arg8: memref<2x256xf32, #tpu.memory_space<vmem>>, %arg9: memref<2x32x256xf32, #tpu.memory_space<vmem>>, %arg10: memref<32x256xf32, #tpu.memory_space<vmem>>, %arg11: memref<1x32x256xf32, #tpu.memory_space<vmem>>) attributes {dimension_semantics = [#tpu.dimension_semantics<parallel>], iteration_bounds = array<i64: 2>, scalar_prefetch = 0 : i64, scratch_operands = 0 : i64, tpu.core_type = #tpu.core_type<tc>, window_params = [{transform_indices = @transform_0, window_bounds = array<i64: 1, 32, 256>}, {pipeline_mode = #tpu.pipeline_mode<synchronous>, transform_indices = @transform_1, window_bounds = array<i64: 9, 1, 256>}, {pipeline_mode = #tpu.pipeline_mode<synchronous>, transform_indices = @transform_2, window_bounds = array<i64: 32, 288>}, {pipeline_mode = #tpu.pipeline_mode<synchronous>, transform_indices = @transform_3, window_bounds = array<i64: 32, 256>}, {pipeline_mode = #tpu.pipeline_mode<synchronous>, transform_indices = @transform_4, window_bounds = array<i64: 32, 288>}, {pipeline_mode = #tpu.pipeline_mode<synchronous>, transform_indices = @transform_5, window_bounds = array<i64: 32, 256>}, {pipeline_mode = #tpu.pipeline_mode<synchronous>, transform_indices = @transform_6, window_bounds = array<i64: 2, 256>}, {pipeline_mode = #tpu.pipeline_mode<synchronous>, transform_indices = @transform_7, window_bounds = array<i64: 2, 256>}, {pipeline_mode = #tpu.pipeline_mode<synchronous>, transform_indices = @transform_8, window_bounds = array<i64: 2, 32, 256>}, {pipeline_mode = #tpu.pipeline_mode<synchronous>, transform_indices = @transform_9, window_bounds = array<i64: 32, 256>}, {transform_indices = @transform_10, window_bounds = array<i64: 1, 32, 256>}]} {
    %c0 = arith.constant 0 : index
    %c0_0 = arith.constant 0 : index
    %c0_1 = arith.constant 0 : index
    %0 = vector.load %arg1[%c0, %c0_0, %c0_1] : memref<1x32x256xf32, #tpu.memory_space<vmem>>, vector<1x32x256xf32>
    %1 = vector.shape_cast %0 : vector<1x32x256xf32> to vector<32x256xf32>
    %c17_i32 = arith.constant 17 : i32
    %2 = tpu.dynamic_rotate %1 by %c17_i32 dim 1 : vector<32x256xf32>, i32 -> vector<32x256xf32>
    %c0_2 = arith.constant 0 : index
    %c0_3 = arith.constant 0 : index
    %c0_4 = arith.constant 0 : index
    %3 = vector.load %arg2[%c0_2, %c0_3, %c0_4] : memref<9x1x256xf32, #tpu.memory_space<vmem>>, vector<1x1x256xf32>
    %4 = vector.shape_cast %3 : vector<1x1x256xf32> to vector<1x256xf32>
    %5 = vector.broadcast %4 : vector<1x256xf32> to vector<32x256xf32>
    %6 = arith.mulf %2, %5 : vector<32x256xf32>
    %c16_i32 = arith.constant 16 : i32
    %7 = tpu.dynamic_rotate %1 by %c16_i32 dim 1 : vector<32x256xf32>, i32 -> vector<32x256xf32>
    %c1 = arith.constant 1 : index
    %c0_5 = arith.constant 0 : index
    %c0_6 = arith.constant 0 : index
    %8 = vector.load %arg2[%c1, %c0_5, %c0_6] : memref<9x1x256xf32, #tpu.memory_space<vmem>>, vector<1x1x256xf32>
    %9 = vector.shape_cast %8 : vector<1x1x256xf32> to vector<1x256xf32>
    %10 = vector.broadcast %9 : vector<1x256xf32> to vector<32x256xf32>
    %11 = arith.mulf %7, %10 : vector<32x256xf32>
    %c15_i32 = arith.constant 15 : i32
    %12 = tpu.dynamic_rotate %1 by %c15_i32 dim 1 : vector<32x256xf32>, i32 -> vector<32x256xf32>
    %c2 = arith.constant 2 : index
    %c0_7 = arith.constant 0 : index
    %c0_8 = arith.constant 0 : index
    %13 = vector.load %arg2[%c2, %c0_7, %c0_8] : memref<9x1x256xf32, #tpu.memory_space<vmem>>, vector<1x1x256xf32>
    %14 = vector.shape_cast %13 : vector<1x1x256xf32> to vector<1x256xf32>
    %15 = vector.broadcast %14 : vector<1x256xf32> to vector<32x256xf32>
    %16 = arith.mulf %12, %15 : vector<32x256xf32>
    %c1_i32 = arith.constant 1 : i32
    %17 = tpu.dynamic_rotate %1 by %c1_i32 dim 1 : vector<32x256xf32>, i32 -> vector<32x256xf32>
    %c3 = arith.constant 3 : index
    %c0_9 = arith.constant 0 : index
    %c0_10 = arith.constant 0 : index
    %18 = vector.load %arg2[%c3, %c0_9, %c0_10] : memref<9x1x256xf32, #tpu.memory_space<vmem>>, vector<1x1x256xf32>
    %19 = vector.shape_cast %18 : vector<1x1x256xf32> to vector<1x256xf32>
    %20 = vector.broadcast %19 : vector<1x256xf32> to vector<32x256xf32>
    %21 = arith.mulf %17, %20 : vector<32x256xf32>
    %c4 = arith.constant 4 : index
    %c0_11 = arith.constant 0 : index
    %c0_12 = arith.constant 0 : index
    %22 = vector.load %arg2[%c4, %c0_11, %c0_12] : memref<9x1x256xf32, #tpu.memory_space<vmem>>, vector<1x1x256xf32>
    %23 = vector.shape_cast %22 : vector<1x1x256xf32> to vector<1x256xf32>
    %24 = vector.broadcast %23 : vector<1x256xf32> to vector<32x256xf32>
    %25 = arith.mulf %1, %24 : vector<32x256xf32>
    %c255_i32 = arith.constant 255 : i32
    %26 = tpu.dynamic_rotate %1 by %c255_i32 dim 1 : vector<32x256xf32>, i32 -> vector<32x256xf32>
    %c5 = arith.constant 5 : index
    %c0_13 = arith.constant 0 : index
    %c0_14 = arith.constant 0 : index
    %27 = vector.load %arg2[%c5, %c0_13, %c0_14] : memref<9x1x256xf32, #tpu.memory_space<vmem>>, vector<1x1x256xf32>
    %28 = vector.shape_cast %27 : vector<1x1x256xf32> to vector<1x256xf32>
    %29 = vector.broadcast %28 : vector<1x256xf32> to vector<32x256xf32>
    %30 = arith.mulf %26, %29 : vector<32x256xf32>
    %c241_i32 = arith.constant 241 : i32
    %31 = tpu.dynamic_rotate %1 by %c241_i32 dim 1 : vector<32x256xf32>, i32 -> vector<32x256xf32>
    %c6 = arith.constant 6 : index
    %c0_15 = arith.constant 0 : index
    %c0_16 = arith.constant 0 : index
    %32 = vector.load %arg2[%c6, %c0_15, %c0_16] : memref<9x1x256xf32, #tpu.memory_space<vmem>>, vector<1x1x256xf32>
    %33 = vector.shape_cast %32 : vector<1x1x256xf32> to vector<1x256xf32>
    %34 = vector.broadcast %33 : vector<1x256xf32> to vector<32x256xf32>
    %35 = arith.mulf %31, %34 : vector<32x256xf32>
    %c240_i32 = arith.constant 240 : i32
    %36 = tpu.dynamic_rotate %1 by %c240_i32 dim 1 : vector<32x256xf32>, i32 -> vector<32x256xf32>
    %c7 = arith.constant 7 : index
    %c0_17 = arith.constant 0 : index
    %c0_18 = arith.constant 0 : index
    %37 = vector.load %arg2[%c7, %c0_17, %c0_18] : memref<9x1x256xf32, #tpu.memory_space<vmem>>, vector<1x1x256xf32>
    %38 = vector.shape_cast %37 : vector<1x1x256xf32> to vector<1x256xf32>
    %39 = vector.broadcast %38 : vector<1x256xf32> to vector<32x256xf32>
    %40 = arith.mulf %36, %39 : vector<32x256xf32>
    %c239_i32 = arith.constant 239 : i32
    %41 = tpu.dynamic_rotate %1 by %c239_i32 dim 1 : vector<32x256xf32>, i32 -> vector<32x256xf32>
    %c8 = arith.constant 8 : index
    %c0_19 = arith.constant 0 : index
    %c0_20 = arith.constant 0 : index
    %42 = vector.load %arg2[%c8, %c0_19, %c0_20] : memref<9x1x256xf32, #tpu.memory_space<vmem>>, vector<1x1x256xf32>
    %43 = vector.shape_cast %42 : vector<1x1x256xf32> to vector<1x256xf32>
    %44 = vector.broadcast %43 : vector<1x256xf32> to vector<32x256xf32>
    %45 = arith.mulf %41, %44 : vector<32x256xf32>
    %46 = tpu.concatenate %6, %11, %16, %21, %25, %30, %35, %40, %45 in 0 : vector<32x256xf32>, vector<32x256xf32>, vector<32x256xf32>, vector<32x256xf32>, vector<32x256xf32>, vector<32x256xf32>, vector<32x256xf32>, vector<32x256xf32>, vector<32x256xf32> -> vector<288x256xf32>
    %c0_21 = arith.constant 0 : index
    %c0_22 = arith.constant 0 : index
    %47 = vector.load %arg3[%c0_21, %c0_22] : memref<32x288xf32, #tpu.memory_space<vmem>>, vector<32x288xf32>
    %cst = arith.constant dense<0.000000e+00> : vector<32x256xf32>
    %48 = tpu.matmul %47, %46, %cst {dimension_numbers = #tpu.dot_dimension_numbers<[1], [0], [0], [1], [0, 0, 1, 1], [], []>} : vector<32x288xf32>, vector<288x256xf32>, vector<32x256xf32> -> vector<32x256xf32>
    %c0_23 = arith.constant 0 : index
    %c0_24 = arith.constant 0 : index
    %49 = vector.load %arg4[%c0_23, %c0_24] : memref<32x256xf32, #tpu.memory_space<vmem>>, vector<32x256xf32>
    %50 = arith.addf %48, %49 : vector<32x256xf32>
    %cst_25 = arith.constant 0.000000e+00 : f32
    %51 = vector.broadcast %cst_25 : f32 to vector<32x256xf32>
    %52 = arith.maximumf %50, %51 : vector<32x256xf32>
    %c17_i32_26 = arith.constant 17 : i32
    %53 = tpu.dynamic_rotate %52 by %c17_i32_26 dim 1 : vector<32x256xf32>, i32 -> vector<32x256xf32>
    %c0_27 = arith.constant 0 : index
    %c0_28 = arith.constant 0 : index
    %c0_29 = arith.constant 0 : index
    %54 = vector.load %arg2[%c0_27, %c0_28, %c0_29] : memref<9x1x256xf32, #tpu.memory_space<vmem>>, vector<1x1x256xf32>
    %55 = vector.shape_cast %54 : vector<1x1x256xf32> to vector<1x256xf32>
    %56 = vector.broadcast %55 : vector<1x256xf32> to vector<32x256xf32>
    %57 = arith.mulf %53, %56 : vector<32x256xf32>
    %c16_i32_30 = arith.constant 16 : i32
    %58 = tpu.dynamic_rotate %52 by %c16_i32_30 dim 1 : vector<32x256xf32>, i32 -> vector<32x256xf32>
    %c1_31 = arith.constant 1 : index
    %c0_32 = arith.constant 0 : index
    %c0_33 = arith.constant 0 : index
    %59 = vector.load %arg2[%c1_31, %c0_32, %c0_33] : memref<9x1x256xf32, #tpu.memory_space<vmem>>, vector<1x1x256xf32>
    %60 = vector.shape_cast %59 : vector<1x1x256xf32> to vector<1x256xf32>
    %61 = vector.broadcast %60 : vector<1x256xf32> to vector<32x256xf32>
    %62 = arith.mulf %58, %61 : vector<32x256xf32>
    %c15_i32_34 = arith.constant 15 : i32
    %63 = tpu.dynamic_rotate %52 by %c15_i32_34 dim 1 : vector<32x256xf32>, i32 -> vector<32x256xf32>
    %c2_35 = arith.constant 2 : index
    %c0_36 = arith.constant 0 : index
    %c0_37 = arith.constant 0 : index
    %64 = vector.load %arg2[%c2_35, %c0_36, %c0_37] : memref<9x1x256xf32, #tpu.memory_space<vmem>>, vector<1x1x256xf32>
    %65 = vector.shape_cast %64 : vector<1x1x256xf32> to vector<1x256xf32>
    %66 = vector.broadcast %65 : vector<1x256xf32> to vector<32x256xf32>
    %67 = arith.mulf %63, %66 : vector<32x256xf32>
    %c1_i32_38 = arith.constant 1 : i32
    %68 = tpu.dynamic_rotate %52 by %c1_i32_38 dim 1 : vector<32x256xf32>, i32 -> vector<32x256xf32>
    %c3_39 = arith.constant 3 : index
    %c0_40 = arith.constant 0 : index
    %c0_41 = arith.constant 0 : index
    %69 = vector.load %arg2[%c3_39, %c0_40, %c0_41] : memref<9x1x256xf32, #tpu.memory_space<vmem>>, vector<1x1x256xf32>
    %70 = vector.shape_cast %69 : vector<1x1x256xf32> to vector<1x256xf32>
    %71 = vector.broadcast %70 : vector<1x256xf32> to vector<32x256xf32>
    %72 = arith.mulf %68, %71 : vector<32x256xf32>
    %c4_42 = arith.constant 4 : index
    %c0_43 = arith.constant 0 : index
    %c0_44 = arith.constant 0 : index
    %73 = vector.load %arg2[%c4_42, %c0_43, %c0_44] : memref<9x1x256xf32, #tpu.memory_space<vmem>>, vector<1x1x256xf32>
    %74 = vector.shape_cast %73 : vector<1x1x256xf32> to vector<1x256xf32>
    %75 = vector.broadcast %74 : vector<1x256xf32> to vector<32x256xf32>
    %76 = arith.mulf %52, %75 : vector<32x256xf32>
    %c255_i32_45 = arith.constant 255 : i32
    %77 = tpu.dynamic_rotate %52 by %c255_i32_45 dim 1 : vector<32x256xf32>, i32 -> vector<32x256xf32>
    %c5_46 = arith.constant 5 : index
    %c0_47 = arith.constant 0 : index
    %c0_48 = arith.constant 0 : index
    %78 = vector.load %arg2[%c5_46, %c0_47, %c0_48] : memref<9x1x256xf32, #tpu.memory_space<vmem>>, vector<1x1x256xf32>
    %79 = vector.shape_cast %78 : vector<1x1x256xf32> to vector<1x256xf32>
    %80 = vector.broadcast %79 : vector<1x256xf32> to vector<32x256xf32>
    %81 = arith.mulf %77, %80 : vector<32x256xf32>
    %c241_i32_49 = arith.constant 241 : i32
    %82 = tpu.dynamic_rotate %52 by %c241_i32_49 dim 1 : vector<32x256xf32>, i32 -> vector<32x256xf32>
    %c6_50 = arith.constant 6 : index
    %c0_51 = arith.constant 0 : index
    %c0_52 = arith.constant 0 : index
    %83 = vector.load %arg2[%c6_50, %c0_51, %c0_52] : memref<9x1x256xf32, #tpu.memory_space<vmem>>, vector<1x1x256xf32>
    %84 = vector.shape_cast %83 : vector<1x1x256xf32> to vector<1x256xf32>
    %85 = vector.broadcast %84 : vector<1x256xf32> to vector<32x256xf32>
    %86 = arith.mulf %82, %85 : vector<32x256xf32>
    %c240_i32_53 = arith.constant 240 : i32
    %87 = tpu.dynamic_rotate %52 by %c240_i32_53 dim 1 : vector<32x256xf32>, i32 -> vector<32x256xf32>
    %c7_54 = arith.constant 7 : index
    %c0_55 = arith.constant 0 : index
    %c0_56 = arith.constant 0 : index
    %88 = vector.load %arg2[%c7_54, %c0_55, %c0_56] : memref<9x1x256xf32, #tpu.memory_space<vmem>>, vector<1x1x256xf32>
    %89 = vector.shape_cast %88 : vector<1x1x256xf32> to vector<1x256xf32>
    %90 = vector.broadcast %89 : vector<1x256xf32> to vector<32x256xf32>
    %91 = arith.mulf %87, %90 : vector<32x256xf32>
    %c239_i32_57 = arith.constant 239 : i32
    %92 = tpu.dynamic_rotate %52 by %c239_i32_57 dim 1 : vector<32x256xf32>, i32 -> vector<32x256xf32>
    %c8_58 = arith.constant 8 : index
    %c0_59 = arith.constant 0 : index
    %c0_60 = arith.constant 0 : index
    %93 = vector.load %arg2[%c8_58, %c0_59, %c0_60] : memref<9x1x256xf32, #tpu.memory_space<vmem>>, vector<1x1x256xf32>
    %94 = vector.shape_cast %93 : vector<1x1x256xf32> to vector<1x256xf32>
    %95 = vector.broadcast %94 : vector<1x256xf32> to vector<32x256xf32>
    %96 = arith.mulf %92, %95 : vector<32x256xf32>
    %97 = tpu.concatenate %57, %62, %67, %72, %76, %81, %86, %91, %96 in 0 : vector<32x256xf32>, vector<32x256xf32>, vector<32x256xf32>, vector<32x256xf32>, vector<32x256xf32>, vector<32x256xf32>, vector<32x256xf32>, vector<32x256xf32>, vector<32x256xf32> -> vector<288x256xf32>
    %c0_61 = arith.constant 0 : index
    %c0_62 = arith.constant 0 : index
    %98 = vector.load %arg5[%c0_61, %c0_62] : memref<32x288xf32, #tpu.memory_space<vmem>>, vector<32x288xf32>
    %cst_63 = arith.constant dense<0.000000e+00> : vector<32x256xf32>
    %99 = tpu.matmul %98, %97, %cst_63 {dimension_numbers = #tpu.dot_dimension_numbers<[1], [0], [0], [1], [0, 0, 1, 1], [], []>} : vector<32x288xf32>, vector<288x256xf32>, vector<32x256xf32> -> vector<32x256xf32>
    %c0_64 = arith.constant 0 : index
    %c0_65 = arith.constant 0 : index
    %100 = vector.load %arg6[%c0_64, %c0_65] : memref<32x256xf32, #tpu.memory_space<vmem>>, vector<32x256xf32>
    %101 = arith.addf %99, %100 : vector<32x256xf32>
    %cst_66 = arith.constant dense<0.000000e+00> : vector<256xf32>
    %102 = vector.multi_reduction <add>, %101, %cst_66 [0] : vector<32x256xf32> to vector<256xf32>
    %103 = vector.shape_cast %102 : vector<256xf32> to vector<1x256xf32>
    %cst_67 = arith.constant 3.200000e+01 : f32
    %104 = vector.broadcast %cst_67 : f32 to vector<1x256xf32>
    %105 = arith.divf %103, %104 : vector<1x256xf32>
    %c0_68 = arith.constant 0 : index
    %c0_69 = arith.constant 0 : index
    %106 = vector.load %arg10[%c0_68, %c0_69] : memref<32x256xf32, #tpu.memory_space<vmem>>, vector<32x256xf32>
    %c0_70 = arith.constant 0 : index
    %c0_71 = arith.constant 0 : index
    %107 = vector.load %arg7[%c0_70, %c0_71] : memref<2x256xf32, #tpu.memory_space<vmem>>, vector<1x256xf32>
    %108 = arith.mulf %105, %107 : vector<1x256xf32>
    %c0_72 = arith.constant 0 : index
    %c0_73 = arith.constant 0 : index
    %109 = vector.load %arg8[%c0_72, %c0_73] : memref<2x256xf32, #tpu.memory_space<vmem>>, vector<1x256xf32>
    %110 = arith.addf %108, %109 : vector<1x256xf32>
    %cst_74 = arith.constant 0.000000e+00 : f32
    %111 = vector.broadcast %cst_74 : f32 to vector<1x256xf32>
    %112 = arith.maximumf %110, %111 : vector<1x256xf32>
    %c0_75 = arith.constant 0 : index
    %c0_76 = arith.constant 0 : index
    %c0_77 = arith.constant 0 : index
    %113 = vector.load %arg9[%c0_75, %c0_76, %c0_77] : memref<2x32x256xf32, #tpu.memory_space<vmem>>, vector<1x32x256xf32>
    %114 = vector.shape_cast %113 : vector<1x32x256xf32> to vector<32x256xf32>
    %115 = vector.broadcast %112 : vector<1x256xf32> to vector<32x256xf32>
    %116 = arith.mulf %115, %114 : vector<32x256xf32>
    %117 = arith.addf %106, %116 : vector<32x256xf32>
    %c1_78 = arith.constant 1 : index
    %c0_79 = arith.constant 0 : index
    %118 = vector.load %arg7[%c1_78, %c0_79] : memref<2x256xf32, #tpu.memory_space<vmem>>, vector<1x256xf32>
    %119 = arith.mulf %105, %118 : vector<1x256xf32>
    %c1_80 = arith.constant 1 : index
    %c0_81 = arith.constant 0 : index
    %120 = vector.load %arg8[%c1_80, %c0_81] : memref<2x256xf32, #tpu.memory_space<vmem>>, vector<1x256xf32>
    %121 = arith.addf %119, %120 : vector<1x256xf32>
    %cst_82 = arith.constant 0.000000e+00 : f32
    %122 = vector.broadcast %cst_82 : f32 to vector<1x256xf32>
    %123 = arith.maximumf %121, %122 : vector<1x256xf32>
    %c1_83 = arith.constant 1 : index
    %c0_84 = arith.constant 0 : index
    %c0_85 = arith.constant 0 : index
    %124 = vector.load %arg9[%c1_83, %c0_84, %c0_85] : memref<2x32x256xf32, #tpu.memory_space<vmem>>, vector<1x32x256xf32>
    %125 = vector.shape_cast %124 : vector<1x32x256xf32> to vector<32x256xf32>
    %126 = vector.broadcast %123 : vector<1x256xf32> to vector<32x256xf32>
    %127 = arith.mulf %126, %125 : vector<32x256xf32>
    %128 = arith.addf %117, %127 : vector<32x256xf32>
    %129 = arith.negf %128 : vector<32x256xf32>
    %130 = math.exp %129 : vector<32x256xf32>
    %cst_86 = arith.constant 1.000000e+00 : f32
    %131 = vector.broadcast %cst_86 : f32 to vector<32x256xf32>
    %132 = arith.addf %131, %130 : vector<32x256xf32>
    %133 = arith.divf %131, %132 : vector<32x256xf32>
    %134 = arith.mulf %101, %133 : vector<32x256xf32>
    %135 = arith.addf %134, %1 : vector<32x256xf32>
    %cst_87 = arith.constant 0.000000e+00 : f32
    %136 = vector.broadcast %cst_87 : f32 to vector<32x256xf32>
    %137 = arith.maximumf %135, %136 : vector<32x256xf32>
    %c0_88 = arith.constant 0 : index
    %c0_89 = arith.constant 0 : index
    %c0_90 = arith.constant 0 : index
    %138 = vector.load %arg11[%c0_88, %c0_89, %c0_90] : memref<1x32x256xf32, #tpu.memory_space<vmem>>, vector<1x32x256xf32>
    %139 = vector.shape_cast %138 : vector<1x32x256xf32> to vector<32x256xf32>
    %140 = vector.shape_cast %137 : vector<32x256xf32> to vector<1x32x256xf32>
    tpu.vector_store %arg11[%c0_88, %c0_89, %c0_90], %140 {strides = array<i32>} : memref<1x32x256xf32, #tpu.memory_space<vmem>>, vector<1x32x256xf32>,
    return
  }
  func.func @transform_0(%arg0: i32) -> (i32, i32, i32) {
    %c0_i32 = arith.constant 0 : i32
    %c0_i32_0 = arith.constant 0 : i32
    %c0_i32_1 = arith.constant 0 : i32
    return %arg0, %c0_i32, %c0_i32_0 : i32, i32, i32
  }
  func.func @transform_1(%arg0: i32) -> (i32, i32, i32) {
    %c0_i32 = arith.constant 0 : i32
    %c0_i32_0 = arith.constant 0 : i32
    %c0_i32_1 = arith.constant 0 : i32
    %c0_i32_2 = arith.constant 0 : i32
    return %c0_i32, %c0_i32_0, %c0_i32_1 : i32, i32, i32
  }
  func.func @transform_2(%arg0: i32) -> (i32, i32) {
    %c0_i32 = arith.constant 0 : i32
    %c0_i32_0 = arith.constant 0 : i32
    %c0_i32_1 = arith.constant 0 : i32
    return %c0_i32, %c0_i32_0 : i32, i32
  }
  func.func @transform_3(%arg0: i32) -> (i32, i32) {
    %c0_i32 = arith.constant 0 : i32
    %c0_i32_0 = arith.constant 0 : i32
    %c0_i32_1 = arith.constant 0 : i32
    return %c0_i32, %c0_i32_0 : i32, i32
  }
  func.func @transform_4(%arg0: i32) -> (i32, i32) {
    %c0_i32 = arith.constant 0 : i32
    %c0_i32_0 = arith.constant 0 : i32
    %c0_i32_1 = arith.constant 0 : i32
    return %c0_i32, %c0_i32_0 : i32, i32
  }
  func.func @transform_5(%arg0: i32) -> (i32, i32) {
    %c0_i32 = arith.constant 0 : i32
    %c0_i32_0 = arith.constant 0 : i32
    %c0_i32_1 = arith.constant 0 : i32
    return %c0_i32, %c0_i32_0 : i32, i32
  }
  func.func @transform_6(%arg0: i32) -> (i32, i32) {
    %c0_i32 = arith.constant 0 : i32
    %c0_i32_0 = arith.constant 0 : i32
    %c0_i32_1 = arith.constant 0 : i32
    return %c0_i32, %c0_i32_0 : i32, i32
  }
  func.func @transform_7(%arg0: i32) -> (i32, i32) {
    %c0_i32 = arith.constant 0 : i32
    %c0_i32_0 = arith.constant 0 : i32
    %c0_i32_1 = arith.constant 0 : i32
    return %c0_i32, %c0_i32_0 : i32, i32
  }
  func.func @transform_8(%arg0: i32) -> (i32, i32, i32) {
    %c0_i32 = arith.constant 0 : i32
    %c0_i32_0 = arith.constant 0 : i32
    %c0_i32_1 = arith.constant 0 : i32
    %c0_i32_2 = arith.constant 0 : i32
    return %c0_i32, %c0_i32_0, %c0_i32_1 : i32, i32, i32
  }
  func.func @transform_9(%arg0: i32) -> (i32, i32) {
    %c0_i32 = arith.constant 0 : i32
    %c0_i32_0 = arith.constant 0 : i32
    %c0_i32_1 = arith.constant 0 : i32
    return %c0_i32, %c0_i32_0 : i32, i32
  }
  func.func @transform_10(%arg0: i32) -> (i32, i32, i32) {
    %c0_i32 = arith.constant 0 : i32
    %c0_i32_0 = arith.constant 0 : i32
    %c0_i32_1 = arith.constant 0 : i32
    return %arg0, %c0_i32, %c0_i32_0 : i32, i32, i32
  }
}

</mosaic_0001>

<bundles_post_ra>
// kernel: pse_basic_block.1
= control target key start
LH: loop header
LB: loop body
LE: loop exit
PB: predicated region body
PF: predicated region fallthrough
CT: control target
= control target key end

     0   :  { %s1940_s13 = smov 0   ;;  %s3341_s0 = inlined_call_operand.vmem [shape: f32[2,32,256], index: 0, kind: input, shape index: {}]   ;;  %s3342_s1 = inlined_call_operand.vmem [shape: f32[9,1,256], index: 1, kind: input, shape index: {}]   ;;  %s3343_s2 = inlined_call_operand.vmem [shape: f32[32,288], index: 2, kind: input, shape index: {}]   ;;  %s3344_s3 = inlined_call_operand.vmem [shape: f32[32,256], index: 3, kind: input, shape index: {}]   ;;  %s3345_s4 = inlined_call_operand.vmem [shape: f32[32,288], index: 4, kind: input, shape index: {}]   ;;  %s3346_s5 = inlined_call_operand.vmem [shape: f32[32,256], index: 5, kind: input, shape index: {}]   ;;  %s3347_s6 = inlined_call_operand.vmem [shape: f32[2,256], index: 6, kind: input, shape index: {}]   ;;  %s3348_s7 = inlined_call_operand.vmem [shape: f32[2,256], index: 7, kind: input, shape index: {}]   ;;  %s3349_s8 = inlined_call_operand.vmem [shape: f32[2,32,256], index: 8, kind: input, shape index: {}]   ;;  %s3350_s9 = inlined_call_operand.vmem [shape: f32[32,256], index: 9, kind: input, shape index: {}]   ;;  %s3351_s10 = inlined_call_operand.vmem [shape: f32[2,32,256], index: 10, kind: output, shape index: {}]  }
   0x1 LB: > { %s1754_s14 = sadd.s32 4294967295, %s1874_s13   ;;  %p1758_p0 = scmp.ge.s32.totalorder %s1874_s13, 1  ;;  %s1874_s13 = sphi %s1940_s13, %s20_s13  }
   0x2   : > { %p312_p1 = scmp.lt.s32.totalorder %s1874_s13, 3 }
   0x4   : > { %p313_p2 = pnand %p1758_p0, %p312_p1 }
   0x6   : > { %316 = sbr.rel (%p313_p2) target bundleno = 980 (0x3d4), region = 60 }
   0xb   : > { %p350_p3 = scmp.lt.s32.totalorder %s1754_s14, 1  ;;  %s1876_s19 = smov 1   ;;  %v384_v11 = vlaneseq  ;;  %v1765_v16 = vld [vmem:[%s3342_s1 + $0x6] sm:$0x3]  ;;  %v1764_v41 = vld [vmem:[%s3342_s1 + $0x4] sm:$0x3] }
   0xc   : > { %s1877_s20 = smov 15   ;;  %s1878_s21 = smov 16   ;;  %v2082_v17 = vperm.slane %v1765_v16, 0  ;;  %v2084_v18 = vperm.slane %v1765_v16, 1  ;;  %v2124_v42 = vperm.slane %v1764_v41, 0  ;;  %v2126_v43 = vperm.slane %v1764_v41, 1 }
   0xd   : > { %s3405_s14 = smov (!%p350_p3, %s1754_s14), 1  ;;  %s1879_s22 = smov 111   ;;  %v2072_v14 = vand.u32 127, %v384_v11  ;;  %v1763_v62 = vld [vmem:[%s3342_s1 + $0x2] sm:$0x3]  ;;  %vm724_vm7 = vcmask 261120  }
   0xe   : > { %s1807_s15 = sshll.u32 %s3405_s14, 6  ;;  %s1880_s23 = smov 17   ;;  %v2162_v63 = vperm.slane %v1763_v62, 0 }
   0xf   : > { %s1956_s18 = scalar_lea.vmem %s3341_s0, %s1807_s15  ;;  %s1881_s24 = smov 112   ;;  %vm505_vm0 = vcmp.lt.s32.totalorder %v2072_v14, 1  ;;  %vm465_vm1 = vcmp.lt.s32.totalorder %v2072_v14, 15  ;;  %vm425_vm2 = vcmp.lt.s32.totalorder %v2072_v14, 16  ;;  %vm680_vm3 = vcmp.lt.s32.totalorder %v2072_v14, 111 }
  0x10   : > { %v1959_v0 = vld [vmem:[%s1956_s18 + $0x30] sm:$0xff]  ;;  %v1962_v1 = vld [vmem:[%s1956_s18 + $0x20] sm:$0xff]  ;;  %v1974_v3 = vld [vmem:[%s1956_s18 + $0x38] sm:$0xff]  ;;  %s1882_s27 = smov 113   ;;  %s1883_s30 = smov 127   ;;  %vm386_vm4 = vcmp.lt.s32.totalorder %v2072_v14, 17 }
  0x11   : > { %495 = vrot.lane.b32.xlu0 %v1959_v0, %s1876_s19  ;;  %493 = vrot.lane.b32.xlu1 %v1962_v1, %s1876_s19  ;;  %v1969_v2 = vld [vmem:[%s1956_s18 + $0x10] sm:$0xff]  ;;  %v1977_v4 = vld [vmem:[%s1956_s18 + $0x28] sm:$0xff]  ;;  %vm640_vm5 = vcmp.lt.s32.totalorder %v2072_v14, 112  ;;  %vm600_vm6 = vcmp.lt.s32.totalorder %v2072_v14, 113  ;;  %vm560_vm8 = vcmp.lt.s32.totalorder %v2072_v14, 127 }
  0x12   : > { %491 = vrot.lane.b32.xlu2 %v1969_v2, %s1876_s19  ;;  %v1980_v5 = vld [vmem:[%s1956_s18 + $0x18] sm:$0xff]  ;;  %v1989_v6 = vld [vmem:[%s1956_s18 + $0x8] sm:$0xff]  ;;  %v1992_v7 = vld [vmem:[%s1956_s18] sm:$0xff] }
  0x19   : > { %503 = vrot.lane.b32.xlu0 %v1974_v3, %s1876_s19  ;;  %501 = vrot.lane.b32.xlu1 %v1977_v4, %s1876_s19 }
  0x1a   : > { %499 = vrot.lane.b32.xlu2 %v1980_v5, %s1876_s19 }
  0x21   : > { %497 = vrot.lane.b32.xlu1 %v1989_v6, %s1876_s19  ;;  %489 = vrot.lane.b32.xlu0 %v1992_v7, %s1876_s19 }
  0x22   : > { %455 = vrot.lane.b32.xlu2 %v1959_v0, %s1877_s20 }
  0x29   : > { %453 = vrot.lane.b32.xlu1 %v1962_v1, %s1877_s20  ;;  %463 = vrot.lane.b32.xlu0 %v1974_v3, %s1877_s20 }
  0x2a   : > { %461 = vrot.lane.b32.xlu2 %v1977_v4, %s1877_s20 }
  0x31   : > { %459 = vrot.lane.b32.xlu1 %v1980_v5, %s1877_s20  ;;  %451 = vrot.lane.b32.xlu0 %v1969_v2, %s1877_s20 }
  0x32   : > { %449 = vrot.lane.b32.xlu2 %v1992_v7, %s1877_s20 }
  0x39   : > { %415 = vrot.lane.b32.xlu1 %v1959_v0, %s1878_s21  ;;  %457 = vrot.lane.b32.xlu0 %v1989_v6, %s1877_s20 }
  0x3a   : > { %423 = vrot.lane.b32.xlu2 %v1974_v3, %s1878_s21 }
  0x41   : > { %678 = vrot.lane.b32.xlu1 %v1974_v3, %s1879_s22  ;;  %670 = vrot.lane.b32.xlu0 %v1959_v0, %s1879_s22 }
  0x42   : > { %413 = vrot.lane.b32.xlu2 %v1962_v1, %s1878_s21 }
  0x49   : > { %668 = vrot.lane.b32.xlu1 %v1962_v1, %s1879_s22  ;;  %421 = vrot.lane.b32.xlu0 %v1977_v4, %s1878_s21 }
  0x4a   : > { %676 = vrot.lane.b32.xlu2 %v1977_v4, %s1879_s22 }
  0x51   : > { %419 = vrot.lane.b32.xlu1 %v1980_v5, %s1878_s21  ;;  %411 = vrot.lane.b32.xlu0 %v1969_v2, %s1878_s21 }
  0x52   : > { %666 = vrot.lane.b32.xlu2 %v1969_v2, %s1879_s22 }
  0x59   : > { %409 = vrot.lane.b32.xlu1 %v1992_v7, %s1878_s21  ;;  %674 = vrot.lane.b32.xlu0 %v1980_v5, %s1879_s22 }
  0x5a   : > { %417 = vrot.lane.b32.xlu2 %v1989_v6, %s1878_s21 }
  0x61   : > { %672 = vrot.lane.b32.xlu1 %v1989_v6, %s1879_s22  ;;  %664 = vrot.lane.b32.xlu0 %v1992_v7, %s1879_s22 }
  0x62   : > { %374 = vrot.lane.b32.xlu2 %v1959_v0, %s1880_s23 }
  0x69   : > { %630 = vrot.lane.b32.xlu1 %v1959_v0, %s1881_s24  ;;  %382 = vrot.lane.b32.xlu0 %v1974_v3, %s1880_s23 }
  0x6a   : > { %638 = vrot.lane.b32.xlu2 %v1974_v3, %s1881_s24 }
  0x6c   : > { %v492_v8 = vpop.permute.xlu2 %491 }
  0x71   : > { %380 = vrot.lane.b32.xlu1 %v1977_v4, %s1880_s23  ;;  %372 = vrot.lane.b32.xlu0 %v1962_v1, %s1880_s23 }
  0x72   : > { %628 = vrot.lane.b32.xlu2 %v1962_v1, %s1881_s24 }
  0x74   : > { %v500_v9 = vpop.permute.xlu2 %499 }
  0x75   : > { %v507_v28 = vsel %vm505_vm0, %v492_v8, %v500_v9  ;;  %v511_v29 = vsel %vm505_vm0, %v500_v9, %v492_v8  ;;  %v2164_v8 = vperm.slane %v1763_v62, 1 }
  0x76   : > { %v523_v32 = vmul.f32 %v2082_v17, %v511_v29  ;;  %v524_v33 = vmul.f32 %v2084_v18, %v507_v28 }
  0x79   : > { %370 = vrot.lane.b32.xlu1 %v1969_v2, %s1880_s23  ;;  %636 = vrot.lane.b32.xlu0 %v1977_v4, %s1881_s24 }
  0x7a   : > { %378 = vrot.lane.b32.xlu2 %v1980_v5, %s1880_s23 }
  0x7c   : > { %v456_v10 = vpop.permute.xlu2 %455 }
  0x81   : > { %634 = vrot.lane.b32.xlu1 %v1980_v5, %s1881_s24  ;;  %626 = vrot.lane.b32.xlu0 %v1969_v2, %s1881_s24 }
  0x82   : > { %368 = vrot.lane.b32.xlu2 %v1992_v7, %s1880_s23 }
  0x83   : > { %v496_v12 = vpop.permute.xlu0 %495  ;;  %v494_v13 = vpop.permute.xlu1 %493 }
  0x84   : > { %v462_v15 = vpop.permute.xlu2 %461 }
  0x89   : > { %624 = vrot.lane.b32.xlu1 %v1992_v7, %s1881_s24  ;;  %376 = vrot.lane.b32.xlu0 %v1989_v6, %s1880_s23 }
  0x8a   : > { %632 = vrot.lane.b32.xlu2 %v1989_v6, %s1881_s24 }
  0x8b   : > { %v504_v19 = vpop.permute.xlu0 %503  ;;  %v502_v20 = vpop.permute.xlu1 %501 }
  0x8c   : > { %v508_v21 = vsel %vm505_vm0, %v494_v13, %v502_v20  ;;  %v512_v22 = vsel %vm505_vm0, %v502_v20, %v494_v13  ;;  %v513_v23 = vsel %vm505_vm0, %v504_v19, %v496_v12  ;;  %v509_v24 = vsel %vm505_vm0, %v496_v12, %v504_v19  ;;  %v2098_v27 = vpop.permute.xlu2 %449 }
  0x8d   : > { %v527_v25 = vmul.f32 %v2082_v17, %v513_v23  ;;  %v528_v26 = vmul.f32 %v2084_v18, %v509_v24  ;;  %v525_v30 = vmul.f32 %v2082_v17, %v512_v22  ;;  %v526_v31 = vmul.f32 %v2084_v18, %v508_v21  ;;  %v2191_v23 = vld [vmem:[%s3342_s1 + $0x10] sm:$0x3] }
  0x8e   : > { %v2195_v24 = vperm.slane %v2191_v23, 0 }
  0x8f   : > { %737 = vmatpush.msra.mxu0 %v527_v25  ;;  %824 = vmatpush.msra.mxu3 %v528_v26 }
  0x90   : > { %3366 = vst [vmem:[#allocation2_spill] sm:$0xff] %v2195_v24 }
  0x91   : > { %738 = vmatpush.msra.mxu0 %v525_v30  ;;  %825 = vmatpush.msra.mxu3 %v526_v31 }
  0x92   : > { %598 = vrot.lane.b32.xlu1 %v1974_v3, %s1882_s27  ;;  %590 = vrot.lane.b32.xlu0 %v1959_v0, %s1882_s27 }
  0x93   : > { %739 = vmatpush.msra.mxu0 %v523_v32  ;;  %826 = vmatpush.msra.mxu3 %v524_v33  ;;  %v498_v34 = vpop.permute.xlu1 %497  ;;  %v490_v35 = vpop.permute.xlu0 %489 }
  0x94   : > { %v506_v36 = vsel %vm505_vm0, %v490_v35, %v498_v34  ;;  %v510_v37 = vsel %vm505_vm0, %v498_v34, %v490_v35  ;;  %588 = vrot.lane.b32.xlu2 %v1962_v1, %s1882_s27  ;;  %v424_v40 = vpop.permute.xlu2 %423 }
  0x95   : > { %v521_v38 = vmul.f32 %v2082_v17, %v510_v37  ;;  %v522_v39 = vmul.f32 %v2084_v18, %v506_v36 }
  0x97   : > { %740 = vmatpush.msra.mxu0 %v521_v38  ;;  %827 = vmatpush.msra.mxu3 %v522_v39 }
  0x9a   : > { %586 = vrot.lane.b32.xlu1 %v1969_v2, %s1882_s27  ;;  %596 = vrot.lane.b32.xlu0 %v1977_v4, %s1882_s27 }
  0x9b   : > { %v454_v44 = vpop.permute.xlu1 %453  ;;  %v464_v45 = vpop.permute.xlu0 %463 }
  0x9c   : > { %v469_v46 = vsel %vm465_vm1, %v456_v10, %v464_v45  ;;  %v473_v47 = vsel %vm465_vm1, %v464_v45, %v456_v10  ;;  %v468_v48 = vsel %vm465_vm1, %v454_v44, %v462_v15  ;;  %v472_v49 = vsel %vm465_vm1, %v462_v15, %v454_v44  ;;  %594 = vrot.lane.b32.xlu2 %v1980_v5, %s1882_s27  ;;  %v414_v54 = vpop.permute.xlu2 %413 }
  0x9d   : > { %v487_v50 = vmul.f32 %v2124_v42, %v473_v47  ;;  %v488_v51 = vmul.f32 %v2126_v43, %v469_v46  ;;  %v485_v52 = vmul.f32 %v2124_v42, %v472_v49  ;;  %v486_v53 = vmul.f32 %v2126_v43, %v468_v48 }
  0x9f   : > { %741 = vmatpush.msra.mxu0 %v487_v50  ;;  %828 = vmatpush.msra.mxu3 %v488_v51 }
  0xa1   : > { %742 = vmatpush.msra.mxu0 %v485_v52  ;;  %829 = vmatpush.msra.mxu3 %v486_v53 }
  0xa2   : > { %592 = vrot.lane.b32.xlu1 %v1989_v6, %s1882_s27  ;;  %584 = vrot.lane.b32.xlu0 %v1992_v7, %s1882_s27 }
  0xa3   : > { %v460_v55 = vpop.permute.xlu1 %459  ;;  %v452_v56 = vpop.permute.xlu0 %451 }
  0xa4   : > { %v467_v57 = vsel %vm465_vm1, %v452_v56, %v460_v55  ;;  %v471_v58 = vsel %vm465_vm1, %v460_v55, %v452_v56  ;;  %550 = vrot.lane.b32.xlu2 %v1959_v0, %s1883_s30  ;;  %v677_v61 = vpop.permute.xlu2 %676 }
  0xa5   : > { %v483_v59 = vmul.f32 %v2124_v42, %v471_v58  ;;  %v484_v60 = vmul.f32 %v2126_v43, %v467_v57 }
  0xa7   : > { %743 = vmatpush.msra.mxu0 %v483_v59  ;;  %830 = vmatpush.msra.mxu3 %v484_v60 }
  0xaa   : > { %548 = vrot.lane.b32.xlu1 %v1962_v1, %s1883_s30  ;;  %558 = vrot.lane.b32.xlu0 %v1974_v3, %s1883_s30 }
  0xab   : > { %v416_v9 = vpop.permute.xlu1 %415  ;;  %v458_v10 = vpop.permute.xlu0 %457 }
  0xac   : > { %v466_v11 = vsel %vm465_vm1, %v2098_v27, %v458_v10  ;;  %v470_v12 = vsel %vm465_vm1, %v458_v10, %v2098_v27  ;;  %v429_v13 = vsel %vm425_vm2, %v416_v9, %v424_v40  ;;  %v433_v15 = vsel %vm425_vm2, %v424_v40, %v416_v9  ;;  %556 = vrot.lane.b32.xlu2 %v1977_v4, %s1883_s30  ;;  %v2186_v22 = vpop.permute.xlu2 %666  ;;  %v395_v9 = vld [vmem:[%s3342_s1] sm:$0x3]  ;;  %v1769_v10 = vld [vmem:[%s3342_s1 + $0xe] sm:$0x3] }
  0xad   : > { %v481_v16 = vmul.f32 %v2124_v42, %v470_v12  ;;  %v482_v19 = vmul.f32 %v2126_v43, %v466_v11  ;;  %v447_v20 = vmul.f32 %v2162_v63, %v433_v15  ;;  %v448_v21 = vmul.f32 %v2164_v8, %v429_v13 }
  0xae   : > { %v2260_v11 = vperm.slane %v395_v9, 0  ;;  %v2262_v12 = vperm.slane %v395_v9, 1  ;;  %v2265_v13 = vperm.slane %v1769_v10, 0  ;;  %v2267_v15 = vperm.slane %v1769_v10, 1 }
  0xaf   : > { %744 = vmatpush.msra.mxu0 %v481_v16  ;;  %831 = vmatpush.msra.mxu3 %v482_v19  ;;  %v2306_v9 = vperm.slane %v2191_v23, 1 }
  0xb1   : > { %745 = vmatpush.msra.mxu0 %v447_v20  ;;  %832 = vmatpush.msra.mxu3 %v448_v21  ;;  %3367 = vst [vmem:[#allocation3_spill] sm:$0xff] %v2306_v9 }
  0xb2   : > { %554 = vrot.lane.b32.xlu1 %v1980_v5, %s1883_s30  ;;  %546 = vrot.lane.b32.xlu0 %v1969_v2, %s1883_s30 }
  0xb3   : > { %v679_v25 = vpop.permute.xlu1 %678  ;;  %v671_v26 = vpop.permute.xlu0 %670 }
  0xb4   : > { %v2203_v27 = vsel %vm680_vm3, %v679_v25, %v671_v26  ;;  %v684_v28 = vsel %vm680_vm3, %v671_v26, %v679_v25  ;;  %544 = vrot.lane.b32.xlu2 %v1992_v7, %s1883_s30  ;;  %v418_v30 = vpop.permute.xlu2 %417 }
  0xb5   : > { %v702_v29 = vmul.f32 %v2195_v24, %v684_v28 }
  0xb7   : > { %807 = vmatpush.msra.mxu2 %v702_v29 }
  0xba   : > { %552 = vrot.lane.b32.xlu0 %v1989_v6, %s1883_s30 }
  0xbb   : > { %v669_v31 = vpop.permute.xlu1 %668  ;;  %v422_v32 = vpop.permute.xlu0 %421 }
  0xbc   : > { %v428_v33 = vsel %vm425_vm2, %v414_v54, %v422_v32  ;;  %v432_v34 = vsel %vm425_vm2, %v422_v32, %v414_v54  ;;  %v683_v35 = vsel %vm680_vm3, %v669_v31, %v677_v61  ;;  %v2220_v36 = vsel %vm680_vm3, %v677_v61, %v669_v31  ;;  %v375_v40 = vpop.permute.xlu2 %374 }
  0xbd   : > { %v445_v37 = vmul.f32 %v2162_v63, %v432_v34  ;;  %v446_v38 = vmul.f32 %v2164_v8, %v428_v33  ;;  %v700_v39 = vmul.f32 %v2195_v24, %v683_v35 }
  0xbf   : > { %746 = vmatpush.msra.mxu0 %v445_v37  ;;  %833 = vmatpush.msra.mxu3 %v446_v38 }
  0xc0   : > { %808 = vmatpush.msra.mxu2 %v700_v39 }
  0xc3   : > { %v420_v41 = vpop.permute.xlu1 %419  ;;  %v412_v44 = vpop.permute.xlu0 %411 }
  0xc4   : > { %v427_v45 = vsel %vm425_vm2, %v412_v44, %v420_v41  ;;  %v431_v46 = vsel %vm425_vm2, %v420_v41, %v412_v44  ;;  %v639_v49 = vpop.permute.xlu2 %638 }
  0xc5   : > { %v443_v47 = vmul.f32 %v2162_v63, %v431_v46  ;;  %v444_v48 = vmul.f32 %v2164_v8, %v427_v45 }
  0xc7   : > { %747 = vmatpush.msra.mxu0 %v443_v47  ;;  %834 = vmatpush.msra.mxu3 %v444_v48 }
  0xcb   : > { %v410_v50 = vpop.permute.xlu1 %409  ;;  %v2231_v51 = vpop.permute.xlu0 %674 }
  0xcc   : > { %v682_v52 = vsel %vm680_vm3, %v2186_v22, %v2231_v51  ;;  %v426_v53 = vsel %vm425_vm2, %v410_v50, %v418_v30  ;;  %v430_v54 = vsel %vm425_vm2, %v418_v30, %v410_v50  ;;  %v629_v61 = vpop.permute.xlu2 %628 }
  0xcd   : > { %v698_v55 = vmul.f32 %v2195_v24, %v682_v52  ;;  %v441_v56 = vmul.f32 %v2162_v63, %v430_v54  ;;  %v442_v57 = vmul.f32 %v2164_v8, %v426_v53 }
  0xcf   : > { %809 = vmatpush.msra.mxu2 %v698_v55  ;;  %748 = vmatpush.msra.mxu0 %v441_v56 }
  0xd0   : > { %835 = vmatpush.msra.mxu3 %v442_v57 }
  0xd3   : > { %v2244_v58 = vpop.permute.xlu1 %672  ;;  %v2246_v59 = vpop.permute.xlu0 %664 }
  0xd4   : > { %v681_v60 = vsel %vm680_vm3, %v2246_v59, %v2244_v58  ;;  %v379_v32 = vpop.permute.xlu2 %378 }
  0xd5   : > { %v696_v62 = vmul.f32 %v2195_v24, %v681_v60 }
  0xd7   : > { %810 = vmatpush.msra.mxu2 %v696_v62 }
  0xdb   : > { %v631_v16 = vpop.permute.xlu1 %630  ;;  %v383_v19 = vpop.permute.xlu0 %382 }
  0xdc   : > { %v390_v20 = vsel %vm386_vm4, %v375_v40, %v383_v19  ;;  %v394_v21 = vsel %vm386_vm4, %v383_v19, %v375_v40  ;;  %v648_v25 = vsel %vm640_vm5, %v639_v49, %v631_v16  ;;  %v644_v26 = vsel %vm640_vm5, %v631_v16, %v639_v49  ;;  %v369_v40 = vpop.permute.xlu2 %368 }
  0xdd   : > { %v407_v28 = vmul.f32 %v2260_v11, %v394_v21  ;;  %v408_v29 = vmul.f32 %v2262_v12, %v390_v20  ;;  %v662_v30 = vmul.f32 %v2265_v13, %v644_v26  ;;  %v663_v31 = vmul.f32 %v2267_v15, %v648_v25 }
  0xdf   : > { %749 = vmatpush.msra.mxu0 %v407_v28  ;;  %836 = vmatpush.msra.mxu3 %v408_v29 }
  0xe0   : > { %766 = vmatpush.msra.mxu1 %v662_v30  ;;  %853 = vmatpush.msrb.mxu2 %v663_v31  ;;  %v703_v31 = vmul.f32 %v2306_v9, %v2203_v27  ;;  %v685_v27 = vsel %vm680_vm3, %v2244_v58, %v2246_v59 }
  0xe3   : > { %v381_v33 = vpop.permute.xlu1 %380  ;;  %v373_v34 = vpop.permute.xlu0 %372 }
  0xe4   : > { %v389_v35 = vsel %vm386_vm4, %v373_v34, %v381_v33  ;;  %v393_v37 = vsel %vm386_vm4, %v381_v33, %v373_v34  ;;  %v633_v54 = vpop.permute.xlu2 %632  ;;  %v1768_v33 = vld [vmem:[%s3342_s1 + $0xc] sm:$0x3]  ;;  %v701_v34 = vmul.f32 %v2306_v9, %v2220_v36  ;;  %v697_v36 = vmul.f32 %v2306_v9, %v685_v27 }
  0xe5   : > { %v405_v38 = vmul.f32 %v2260_v11, %v393_v37  ;;  %v406_v39 = vmul.f32 %v2262_v12, %v389_v35  ;;  %v2339_v35 = vperm.slane %v1768_v33, 1 }
  0xe7   : > { %750 = vmatpush.msra.mxu0 %v405_v38  ;;  %837 = vmatpush.msra.mxu3 %v406_v39  ;;  %3368 = vst [vmem:[#allocation4_spill] sm:$0xff] %v2339_v35 }
  0xeb   : > { %v371_v41 = vpop.permute.xlu1 %370  ;;  %v637_v44 = vpop.permute.xlu0 %636 }
  0xec   : > { %v643_v45 = vsel %vm640_vm5, %v629_v61, %v637_v44  ;;  %v647_v46 = vsel %vm640_vm5, %v637_v44, %v629_v61  ;;  %v388_v47 = vsel %vm386_vm4, %v371_v41, %v379_v32  ;;  %v392_v48 = vsel %vm386_vm4, %v379_v32, %v371_v41 }
  0xed   : > { %v660_v49 = vmul.f32 %v2265_v13, %v643_v45  ;;  %v661_v50 = vmul.f32 %v2267_v15, %v647_v46  ;;  %v403_v52 = vmul.f32 %v2260_v11, %v392_v48  ;;  %v404_v53 = vmul.f32 %v2262_v12, %v388_v47 }
  0xee   : > { %v589_v26 = vpop.permute.xlu2 %588  ;;  %v686_v32 = vsel %vm680_vm3, %v2231_v51, %v2186_v22  ;;  %v2337_v51 = vperm.slane %v1768_v33, 0 }
  0xef   : > { %767 = vmatpush.msra.mxu1 %v660_v49  ;;  %854 = vmatpush.msrb.mxu2 %v661_v50  ;;  %v699_v22 = vmul.f32 %v2306_v9, %v686_v32 }
  0xf0   : > { %751 = vmatpush.msra.mxu0 %v403_v52  ;;  %838 = vmatpush.msra.mxu3 %v404_v53 }
  0xf3   : > { %v635_v55 = vpop.permute.xlu1 %634  ;;  %v627_v56 = vpop.permute.xlu0 %626 }
  0xf4   : > { %v642_v57 = vsel %vm640_vm5, %v627_v56, %v635_v55  ;;  %v646_v60 = vsel %vm640_vm5, %v635_v55, %v627_v56 }
  0xf5   : > { %v658_v61 = vmul.f32 %v2265_v13, %v642_v57  ;;  %v659_v62 = vmul.f32 %v2267_v15, %v646_v60  ;;  %v2363_v60 = vld [vmem:[%s3343_s2 + $0x10] sm:$0xff] }
  0xf6   : > { %v595_v41 = vpop.permute.xlu2 %594  ;;  %1771 = vmatmul.msk.f32.vlgmr.msra.gmra.mxu2 %vm724_vm7, %v2363_v60 }
  0xf7   : > { %768 = vmatpush.msra.mxu1 %v658_v61  ;;  %855 = vmatpush.msrb.mxu2 %v659_v62 }
  0xfb   : > { %v625_v10 = vpop.permute.xlu1 %624  ;;  %v377_v16 = vpop.permute.xlu0 %376 }
  0xfc   : > { %v387_v19 = vsel %vm386_vm4, %v369_v40, %v377_v16  ;;  %v391_v20 = vsel %vm386_vm4, %v377_v16, %v369_v40  ;;  %v641_v21 = vsel %vm640_vm5, %v625_v10, %v633_v54  ;;  %v645_v25 = vsel %vm640_vm5, %v633_v54, %v625_v10 }
  0xfd   : > { %v401_v28 = vmul.f32 %v2260_v11, %v391_v20  ;;  %v402_v23 = vmul.f32 %v2262_v12, %v387_v19  ;;  %v656_v29 = vmul.f32 %v2265_v13, %v641_v21  ;;  %v657_v30 = vmul.f32 %v2267_v15, %v645_v25  ;;  %v704_v19 = vld [vmem:[%s3343_s2] sm:$0xff]  ;;  %v1767_v20 = vld [vmem:[%s3342_s1 + $0xa] sm:$0x3] }
  0xfe   : > { %v551_v55 = vpop.permute.xlu2 %550  ;;  %v2380_v21 = vperm.slane %v1767_v20, 0  ;;  %v2382_v25 = vperm.slane %v1767_v20, 1  ;;  %v705_v20 = vld [vmem:[%s3343_s2 + $0x8] sm:$0xff] }
  0xff   : > { %752 = vmatpush.msra.mxu0 %v401_v28  ;;  %839 = vmatpush.msra.mxu3 %v402_v23  ;;  %v2387_v28 = vld [vmem:[%s3343_s2 + $0x28] sm:$0xff] }
 0x100   : > { %769 = vmatpush.msra.mxu1 %v656_v29  ;;  %856 = vmatpush.msrb.mxu2 %v657_v30  ;;  %3369 = vst [vmem:[#allocation5_spill] sm:$0xff] %v2382_v25  ;;  %v707_v30 = vld [vmem:[%s3343_s2 + $0x18] sm:$0xff] }
 0x101   : > { %894 = vmatpush.msrb.mxu0 %v703_v31  ;;  %840 = vmatmul.f32.vlgmr.msra.gmra.mxu3 %v704_v19 }
 0x102   : > { %753 = vmatmul.f32.vlgmr.msra.gmra.mxu0 %v704_v19  ;;  %1772 = vmatmul.msk.f32.gmra.mxu2 %vm724_vm7, %v2387_v28 }
 0x103   : > { %895 = vmatpush.msrb.mxu0 %v701_v34 }
 0x104   : > { %v599_v37 = vpop.permute.xlu1 %598  ;;  %v591_v38 = vpop.permute.xlu0 %590 }
 0x105   : > { %896 = vmatpush.msrb.mxu0 %v699_v22  ;;  %v604_v39 = vsel %vm600_vm6, %v591_v38, %v599_v37  ;;  %v608_v58 = vsel %vm600_vm6, %v599_v37, %v591_v38 }
 0x106   : > { %v622_v59 = vmul.f32 %v2337_v51, %v604_v39  ;;  %v623_v40 = vmul.f32 %v2339_v35, %v608_v58 }
 0x107   : > { %897 = vmatpush.msrb.mxu0 %v697_v36  ;;  %v712_v36 = vld [vmem:[%s3343_s2 + $0x40] sm:$0xff] }
 0x108   : > { %770 = vmatpush.msra.mxu1 %v622_v59  ;;  %857 = vmatpush.msrb.mxu2 %v623_v40  ;;  %v710_v59 = vld [vmem:[%s3343_s2 + $0x30] sm:$0xff] }
 0x109   : > { %843 = vmatmul.f32.gmra.mxu3 %v707_v30 }
 0x10a   : > { %756 = vmatmul.f32.gmra.mxu0 %v707_v30  ;;  %1773 = vmatmul.msk.f32.gmra.mxu2 %vm724_vm7, %v712_v36 }
 0x10c   : > { %v587_v44 = vpop.permute.xlu1 %586  ;;  %v597_v45 = vpop.permute.xlu0 %596 }
 0x10d   : > { %v603_v46 = vsel %vm600_vm6, %v589_v26, %v597_v45  ;;  %v607_v47 = vsel %vm600_vm6, %v597_v45, %v589_v26  ;;  %v602_v48 = vsel %vm600_vm6, %v587_v44, %v595_v41  ;;  %v606_v49 = vsel %vm600_vm6, %v595_v41, %v587_v44  ;;  %v557_v26 = vpop.permute.xlu2 %556 }
 0x10e   : > { %v620_v50 = vmul.f32 %v2337_v51, %v603_v46  ;;  %v621_v52 = vmul.f32 %v2339_v35, %v607_v47  ;;  %v618_v53 = vmul.f32 %v2337_v51, %v602_v48  ;;  %v619_v54 = vmul.f32 %v2339_v35, %v606_v49  ;;  %v1766_v46 = vld [vmem:[%s3342_s1 + $0x8] sm:$0x3]  ;;  %v715_v49 = vld [vmem:[%s3343_s2 + $0x58] sm:$0xff] }
 0x10f   : > { %v2422_v48 = vperm.slane %v1766_v46, 0 }
 0x110   : > { %771 = vmatpush.msra.mxu1 %v620_v50  ;;  %858 = vmatpush.msrb.mxu2 %v621_v52  ;;  %v713_v52 = vld [vmem:[%s3343_s2 + $0x48] sm:$0xff] }
 0x111   : > { %846 = vmatmul.f32.gmra.mxu3 %v710_v59 }
 0x112   : > { %772 = vmatpush.msra.mxu1 %v618_v53  ;;  %859 = vmatpush.msrb.mxu2 %v619_v54 }
 0x113   : > { %759 = vmatmul.f32.gmra.mxu0 %v710_v59  ;;  %1774 = vmatmul.msk.f32.gmra.mxu2 %vm724_vm7, %v715_v49 }
 0x114   : > { %v593_v56 = vpop.permute.xlu1 %592  ;;  %v585_v57 = vpop.permute.xlu0 %584 }
 0x115   : > { %v601_v61 = vsel %vm600_vm6, %v585_v57, %v593_v56  ;;  %v605_v62 = vsel %vm600_vm6, %v593_v56, %v585_v57  ;;  %v545_v47 = vpop.permute.xlu2 %544  ;;  %v542_v57 = vmul.f32 %v2422_v48, %v1959_v0  ;;  %v536_v0 = vmul.f32 %v2422_v48, %v1992_v7  ;;  %v716_v7 = vld [vmem:[%s3344_s3] sm:$0xff] }
 0x116   : > { %v616_v10 = vmul.f32 %v2337_v51, %v601_v61  ;;  %v617_v16 = vmul.f32 %v2339_v35, %v605_v62  ;;  %v540_v61 = vmul.f32 %v2422_v48, %v1962_v1  ;;  %v2441_v62 = vperm.slane %v1766_v46, 1  ;;  %v722_v46 = vld [vmem:[%s3344_s3 + $0x30] sm:$0xff] }
 0x118   : > { %773 = vmatpush.msra.mxu1 %v616_v10  ;;  %860 = vmatpush.msrb.mxu2 %v617_v16  ;;  %3370 = vst [vmem:[#allocation6_spill] sm:$0xff] %v2441_v62  ;;  %v538_v10 = vmul.f32 %v2422_v48, %v1969_v2  ;;  %v543_v16 = vmul.f32 %v2441_v62, %v1974_v3  ;;  %v708_v3 = vld [vmem:[%s3343_s2 + $0x20] sm:$0xff] }
 0x119   : > { %849 = vmatmul.f32.gmra.mxu3 %v713_v52  ;;  %v541_v19 = vmul.f32 %v2441_v62, %v1977_v4  ;;  %v539_v1 = vmul.f32 %v2441_v62, %v1980_v5  ;;  %v537_v2 = vmul.f32 %v2441_v62, %v1989_v6  ;;  %v711_v4 = vld [vmem:[%s3343_s2 + $0x38] sm:$0xff]  ;;  %v714_v5 = vld [vmem:[%s3343_s2 + $0x50] sm:$0xff] }
 0x11b   : > { %762 = vmatmul.f32.gmra.mxu0 %v713_v52 }
 0x11c   : > { %v549_v23 = vpop.permute.xlu1 %548  ;;  %v559_v29 = vpop.permute.xlu0 %558 }
 0x11d   : > { %v564_v31 = vsel %vm560_vm8, %v551_v55, %v559_v29  ;;  %v568_v32 = vsel %vm560_vm8, %v559_v29, %v551_v55  ;;  %v563_v33 = vsel %vm560_vm8, %v549_v23, %v557_v26  ;;  %v567_v34 = vsel %vm560_vm8, %v557_v26, %v549_v23  ;;  %v718_v29 = vld [vmem:[%s3344_s3 + $0x10] sm:$0xff] }
 0x11e   : > { %v582_v27 = vmul.f32 %v2380_v21, %v564_v31  ;;  %v583_v22 = vmul.f32 %v2382_v25, %v568_v32  ;;  %v580_v37 = vmul.f32 %v2380_v21, %v563_v33  ;;  %v581_v38 = vmul.f32 %v2382_v25, %v567_v34 }
 0x11f   : > { %v3389_v14 = vld [vmem:[#allocation6_spill] sm:$0xff] }
 0x120   : > { %774 = vmatpush.msra.mxu1 %v582_v27  ;;  %861 = vmatpush.msrb.mxu2 %v583_v22 }
 0x122   : > { %775 = vmatpush.msra.mxu1 %v580_v37  ;;  %862 = vmatpush.msrb.mxu2 %v581_v38  ;;  %v720_v38 = vld [vmem:[%s3344_s3 + $0x20] sm:$0xff] }
 0x123   : > { %1775 = vmatmul.msk.f32.vlgmr.msrb.gmra.mxu0 %vm724_vm7, %v2363_v60 }
 0x124   : > { %v555_v39 = vpop.permute.xlu1 %554  ;;  %v547_v58 = vpop.permute.xlu0 %546 }
 0x125   : > { %v562_v40 = vsel %vm560_vm8, %v547_v58, %v555_v39  ;;  %v566_v41 = vsel %vm560_vm8, %v555_v39, %v547_v58 }
 0x126   : > { %v578_v44 = vmul.f32 %v2380_v21, %v562_v40  ;;  %v579_v45 = vmul.f32 %v2382_v25, %v566_v41 }
 0x128   : > { %776 = vmatpush.msra.mxu1 %v578_v44  ;;  %863 = vmatpush.msrb.mxu2 %v579_v45 }
 0x12b   : > { %1776 = vmatmul.msk.f32.gmra.mxu0 %vm724_vm7, %v2387_v28 }
 0x12c   : > { %v553_v50 = vpop.permute.xlu0 %552 }
 0x12d   : > { %v561_v53 = vsel %vm560_vm8, %v545_v47, %v553_v50  ;;  %v565_v54 = vsel %vm560_vm8, %v553_v50, %v545_v47 }
 0x12e   : > { %v576_v55 = vmul.f32 %v2380_v21, %v561_v53  ;;  %v577_v56 = vmul.f32 %v2382_v25, %v565_v54 }
 0x130   : > { %777 = vmatpush.msra.mxu1 %v576_v55  ;;  %864 = vmatpush.msrb.mxu2 %v577_v56 }
 0x132   : > { %778 = vmatpush.msra.mxu1 %v542_v57  ;;  %865 = vmatpush.msrb.mxu2 %v543_v16  ;;  %v717_v57 = vld [vmem:[%s3344_s3 + $0x8] sm:$0xff] }
 0x133   : > { %1777 = vmatmul.msk.f32.gmra.mxu0 %vm724_vm7, %v712_v36 }
 0x134   : > { %779 = vmatpush.msra.mxu1 %v540_v61  ;;  %866 = vmatpush.msrb.mxu2 %v541_v19 }
 0x136   : > { %780 = vmatpush.msra.mxu1 %v538_v10  ;;  %867 = vmatpush.msrb.mxu2 %v539_v1 }
 0x138   : > { %781 = vmatpush.msra.mxu1 %v536_v0  ;;  %868 = vmatpush.msrb.mxu2 %v537_v2  ;;  %v719_v0 = vld [vmem:[%s3344_s3 + $0x18] sm:$0xff] }
 0x139   : > { %782 = vmatmul.f32.vlgmr.msra.gmra.mxu1 %v705_v20  ;;  %869 = vmatmul.f32.vlgmr.msrb.gmra.mxu2 %v705_v20 }
 0x13b   : > { %1778 = vmatmul.msk.f32.gmra.mxu0 %vm724_vm7, %v715_v49 }
 0x141   : > { %785 = vmatmul.f32.gmra.mxu1 %v708_v3  ;;  %872 = vmatmul.f32.gmra.mxu2 %v708_v3 }
 0x149   : > { %788 = vmatmul.f32.gmra.mxu1 %v711_v4  ;;  %875 = vmatmul.f32.gmra.mxu2 %v711_v4 }
 0x151   : > { %791 = vmatmul.f32.gmra.mxu1 %v714_v5  ;;  %878 = vmatmul.f32.gmra.mxu2 %v714_v5 }
 0x179   : > { %v812_v26 = vpop.f32.mrf.mxu2 }
 0x17f   : > { %v754_v6 = vpop.f32.mrf.mxu0 }
 0x180   : > { %v755_v60 = vadd.f32 %v754_v6, %v716_v7 }
 0x184   : > { %v841_v56 = vpop.f32.mrf.mxu3 }
 0x185   : > { %v815_v27 = vpop.f32.mrf.mxu2  ;;  %v842_v61 = vadd.f32 %v841_v56, %v717_v57 }
 0x187   : > { %v757_v30 = vpop.f32.mrf.mxu0 }
 0x188   : > { %v758_v33 = vadd.f32 %v757_v30, %v718_v29 }
 0x18c   : > { %v844_v1 = vpop.f32.mrf.mxu3 }
 0x18d   : > { %v818_v41 = vpop.f32.mrf.mxu2  ;;  %v845_v2 = vadd.f32 %v844_v1, %v719_v0 }
 0x190   : > { %v760_v36 = vpop.f32.mrf.mxu0 }
 0x191   : > { %v761_v58 = vadd.f32 %v760_v36, %v720_v38 }
 0x196   : > { %v821_v53 = vpop.f32.mrf.mxu2 }
 0x198   : > { %v763_v47 = vpop.f32.mrf.mxu0 }
 0x199   : > { %v764_v49 = vadd.f32 %v763_v47, %v722_v46 }
 0x1a0   : > { %v899_v19 = vpop.f32.mrf.mxu0 }
 0x1a8   : > { %v902_v6 = vpop.f32.mrf.mxu0 }
 0x1b6   : > { %v783_v28 = vpop.f32.mrf.mxu1 }
 0x1b7   : > { %v784_v23 = vadd.f32 %v783_v28, %v755_v60  ;;  %v847_v28 = vpop.f32.mrf.mxu3 }
 0x1b9   : > { %v813_v31 = vadd.f32 %v812_v26, %v784_v23  ;;  %v721_v26 = vld [vmem:[%s3344_s3 + $0x28] sm:$0xff] }
 0x1ba   : > { %v848_v23 = vadd.f32 %v847_v28, %v721_v26 }
 0x1bb   : > { %v2479_v32 = vmax.f32 %v813_v31, 0.0  ;;  %v905_v31 = vpop.f32.mrf.mxu0 }
 0x1bc   : > { %v870_v10 = vpop.f32.mrf.mxu2 }
 0x1bd   : > { %1055 = vrot.lane.b32.xlu1 %v2479_v32, %s1883_s30  ;;  %1087 = vrot.lane.b32.xlu0 %v2479_v32, %s1882_s27  ;;  %v871_v16 = vadd.f32 %v870_v10, %v842_v61 }
 0x1be   : > { %1119 = vrot.lane.b32.xlu2 %v2479_v32, %s1881_s24  ;;  %v786_v34 = vpop.f32.mrf.mxu1 }
 0x1bf   : > { %v787_v22 = vadd.f32 %v786_v34, %v758_v33  ;;  %v900_v20 = vadd.f32 %v899_v19, %v871_v16 }
 0x1c1   : > { %v816_v37 = vadd.f32 %v815_v27, %v787_v22  ;;  %v2541_v4 = vmax.f32 %v900_v20, 0.0  ;;  %v723_v27 = vld [vmem:[%s3344_s3 + $0x38] sm:$0xff]  ;;  %v850_v22 = vpop.f32.mrf.mxu3 }
 0x1c3   : > { %v2490_v39 = vmax.f32 %v816_v37, 0.0  ;;  %3371 = vst [vmem:[#allocation7_spill] sm:$0xff] %v2541_v4  ;;  %v851_v37 = vadd.f32 %v850_v22, %v723_v27 }
 0x1c4   : > { %v873_v3 = vpop.f32.mrf.mxu2 }
 0x1c5   : > { %1121 = vrot.lane.b32.xlu1 %v2490_v39, %s1881_s24  ;;  %983 = vrot.lane.b32.xlu0 %v2479_v32, %s1877_s20  ;;  %v874_v5 = vadd.f32 %v873_v3, %v845_v2 }
 0x1c6   : > { %1015 = vrot.lane.b32.xlu2 %v2479_v32, %s1876_s19  ;;  %v789_v59 = vpop.f32.mrf.mxu1 }
 0x1c7   : > { %v790_v40 = vadd.f32 %v789_v59, %v761_v58  ;;  %v903_v7 = vadd.f32 %v902_v6, %v874_v5  ;;  %v908_v58 = vpop.f32.mrf.mxu0 }
 0x1c9   : > { %v819_v44 = vadd.f32 %v818_v41, %v790_v40  ;;  %v2549_v60 = vmax.f32 %v903_v7, 0.0 }
 0x1cb   : > { %v2504_v45 = vmax.f32 %v819_v44, 0.0  ;;  %3372 = vst [vmem:[#allocation8_spill] sm:$0xff] %v2549_v60 }
 0x1cc   : > { %v876_v29 = vpop.f32.mrf.mxu2 }
 0x1cd   : > { %1017 = vrot.lane.b32.xlu1 %v2490_v39, %s1876_s19  ;;  %1057 = vrot.lane.b32.xlu0 %v2490_v39, %s1883_s30  ;;  %v877_v30 = vadd.f32 %v876_v29, %v848_v23 }
 0x1ce   : > { %1089 = vrot.lane.b32.xlu2 %v2490_v39, %s1882_s27  ;;  %v792_v50 = vpop.f32.mrf.mxu1 }
 0x1cf   : > { %v793_v52 = vadd.f32 %v792_v50, %v764_v49  ;;  %v906_v33 = vadd.f32 %v905_v31, %v877_v30 }
 0x1d1   : > { %v822_v54 = vadd.f32 %v821_v53, %v793_v52  ;;  %v2566_v34 = vmax.f32 %v906_v33, 0.0 }
 0x1d3   : > { %v2521_v55 = vmax.f32 %v822_v54, 0.0  ;;  %3373 = vst [vmem:[#allocation9_spill] sm:$0xff] %v2566_v34 }
 0x1d4   : > { %v879_v38 = vpop.f32.mrf.mxu2 }
 0x1d5   : > { %1091 = vrot.lane.b32.xlu1 %v2504_v45, %s1882_s27  ;;  %1123 = vrot.lane.b32.xlu0 %v2504_v45, %s1881_s24  ;;  %v880_v36 = vadd.f32 %v879_v38, %v851_v37 }
 0x1d6   : > { %985 = vrot.lane.b32.xlu2 %v2490_v39, %s1877_s20 }
 0x1d7   : > { %v909_v59 = vadd.f32 %v908_v58, %v880_v36 }
 0x1d9   : > { %v2585_v41 = vmax.f32 %v909_v59, 0.0 }
 0x1db   : > { %3374 = vst [vmem:[#allocation10_spill] sm:$0xff] %v2585_v41 }
 0x1dd   : > { %987 = vrot.lane.b32.xlu1 %v2504_v45, %s1877_s20  ;;  %1019 = vrot.lane.b32.xlu0 %v2504_v45, %s1876_s19 }
 0x1de   : > { %1059 = vrot.lane.b32.xlu2 %v2504_v45, %s1883_s30 }
 0x1e5   : > { %1125 = vrot.lane.b32.xlu1 %v2521_v55, %s1881_s24  ;;  %1093 = vrot.lane.b32.xlu0 %v2521_v55, %s1882_s27 }
 0x1e6   : > { %955 = vrot.lane.b32.xlu2 %v2504_v45, %s1878_s21 }
 0x1ed   : > { %1061 = vrot.lane.b32.xlu1 %v2521_v55, %s1883_s30  ;;  %989 = vrot.lane.b32.xlu0 %v2521_v55, %s1877_s20 }
 0x1ee   : > { %1021 = vrot.lane.b32.xlu2 %v2521_v55, %s1876_s19 }
 0x1f5   : > { %957 = vrot.lane.b32.xlu1 %v2521_v55, %s1878_s21  ;;  %1127 = vrot.lane.b32.xlu0 %v2541_v4, %s1881_s24 }
 0x1f6   : > { %1063 = vrot.lane.b32.xlu2 %v2541_v4, %s1883_s30 }
 0x1fd   : > { %1095 = vrot.lane.b32.xlu1 %v2541_v4, %s1882_s27  ;;  %1023 = vrot.lane.b32.xlu0 %v2541_v4, %s1876_s19 }
 0x1fe   : > { %1129 = vrot.lane.b32.xlu2 %v2549_v60, %s1881_s24 }
 0x205   : > { %991 = vrot.lane.b32.xlu1 %v2541_v4, %s1877_s20  ;;  %1097 = vrot.lane.b32.xlu0 %v2549_v60, %s1882_s27 }
 0x206   : > { %1025 = vrot.lane.b32.xlu2 %v2549_v60, %s1876_s19 }
 0x20d   : > { %1065 = vrot.lane.b32.xlu1 %v2549_v60, %s1883_s30  ;;  %993 = vrot.lane.b32.xlu0 %v2549_v60, %s1877_s20 }
 0x20e   : > { %1099 = vrot.lane.b32.xlu2 %v2566_v34, %s1882_s27 }
 0x215   : > { %1131 = vrot.lane.b32.xlu1 %v2566_v34, %s1881_s24  ;;  %1067 = vrot.lane.b32.xlu0 %v2566_v34, %s1883_s30 }
 0x216   : > { %995 = vrot.lane.b32.xlu2 %v2566_v34, %s1877_s20 }
 0x218   : > { %v2583_v40 = vpop.permute.xlu2 %1119 }
 0x21d   : > { %1027 = vrot.lane.b32.xlu1 %v2566_v34, %s1876_s19  ;;  %963 = vrot.lane.b32.xlu0 %v2566_v34, %s1878_s21 }
 0x21e   : > { %1133 = vrot.lane.b32.xlu2 %v2585_v41, %s1881_s24 }
 0x220   : > { %v2593_v44 = vpop.permute.xlu2 %1015 }
 0x225   : > { %961 = vrot.lane.b32.xlu1 %v2549_v60, %s1878_s21  ;;  %1029 = vrot.lane.b32.xlu0 %v2585_v41, %s1876_s19 }
 0x226   : > { %951 = vrot.lane.b32.xlu2 %v2479_v32, %s1878_s21 }
 0x228   : > { %v2601_v46 = vpop.permute.xlu2 %1089 }
 0x22d   : > { %1101 = vrot.lane.b32.xlu1 %v2585_v41, %s1882_s27  ;;  %953 = vrot.lane.b32.xlu0 %v2490_v39, %s1878_s21 }
 0x22e   : > { %921 = vrot.lane.b32.xlu2 %v2490_v39, %s1880_s23 }
 0x22f   : > { %v1056_v47 = vpop.permute.xlu1 %1055  ;;  %v2609_v49 = vpop.permute.xlu0 %1087 }
 0x230   : > { %v2611_v50 = vpop.permute.xlu2 %985 }
 0x235   : > { %997 = vrot.lane.b32.xlu1 %v2585_v41, %s1877_s20  ;;  %959 = vrot.lane.b32.xlu0 %v2541_v4, %s1878_s21 }
 0x236   : > { %1069 = vrot.lane.b32.xlu2 %v2585_v41, %s1883_s30 }
 0x237   : > { %v1122_v52 = vpop.permute.xlu1 %1121  ;;  %v2619_v53 = vpop.permute.xlu0 %983 }
 0x238   : > { %v2621_v54 = vpop.permute.xlu2 %1059 }
 0x23d   : > { %925 = vrot.lane.b32.xlu1 %v2521_v55, %s1880_s23  ;;  %923 = vrot.lane.b32.xlu0 %v2504_v45, %s1880_s23 }
 0x23e   : > { %965 = vrot.lane.b32.xlu2 %v2585_v41, %s1878_s21  ;;  %s3292_s21 = scalar_lea.vmem %s3351_s10, %s1807_s15 }
 0x23f   : > { %v2629_v56 = vpop.permute.xlu1 %1017  ;;  %v2631_v57 = vpop.permute.xlu0 %1057 }
 0x240   : > { %v2633_v61 = vpop.permute.xlu2 %955 }
 0x245   : > { %931 = vrot.lane.b32.xlu1 %v2566_v34, %s1880_s23  ;;  %929 = vrot.lane.b32.xlu0 %v2549_v60, %s1880_s23 }
 0x246   : > { %933 = vrot.lane.b32.xlu2 %v2585_v41, %s1880_s23 }
 0x247   : > { %v2641_v10 = vpop.permute.xlu1 %1091  ;;  %v2643_v16 = vpop.permute.xlu0 %1123 }
 0x248   : > { %v1022_v19 = vpop.permute.xlu2 %1021 }
 0x24d   : > { %919 = vrot.lane.b32.xlu1 %v2479_v32, %s1880_s23  ;;  %1157 = vrot.lane.b32.xlu0 %v2521_v55, %s1879_s22 }
 0x24e   : > { %927 = vrot.lane.b32.xlu2 %v2541_v4, %s1880_s23 }
 0x24f   : > { %v2651_v0 = vpop.permute.xlu1 %987  ;;  %v1020_v1 = vpop.permute.xlu0 %1019 }
 0x250   : > { %v1064_v20 = vpop.permute.xlu2 %1063 }
 0x251   : > { %v2655_v2 = vsel %vm560_vm8, %v1056_v47, %v1064_v20  ;;  %v2659_v3 = vsel %vm560_vm8, %v1064_v20, %v1056_v47 }
 0x252   : > { %3375 = vst [vmem:[#allocation11_spill] sm:$0xff] %v2659_v3 }
 0x255   : > { %1153 = vrot.lane.b32.xlu1 %v2490_v39, %s1879_s22  ;;  %1163 = vrot.lane.b32.xlu0 %v2566_v34, %s1879_s22 }
 0x256   : > { %1155 = vrot.lane.b32.xlu2 %v2504_v45, %s1879_s22 }
 0x257   : > { %v1126_v5 = vpop.permute.xlu1 %1125  ;;  %v2667_v6 = vpop.permute.xlu0 %1093 }
 0x258   : > { %v1130_v7 = vpop.permute.xlu2 %1129 }
 0x259   : > { %v2671_v26 = vsel %vm640_vm5, %v1130_v7, %v1122_v52 }
 0x25a   : > { %3376 = vst [vmem:[#allocation12_spill] sm:$0xff] %v2671_v26 }
 0x25d   : > { %1165 = vrot.lane.b32.xlu1 %v2585_v41, %s1879_s22  ;;  %1151 = vrot.lane.b32.xlu0 %v2479_v32, %s1879_s22 }
 0x25e   : > { %1161 = vrot.lane.b32.xlu2 %v2549_v60, %s1879_s22 }
 0x25f   : > { %v2679_v28 = vpop.permute.xlu1 %1061  ;;  %v2681_v23 = vpop.permute.xlu0 %989 }
 0x260   : > { %v1026_v29 = vpop.permute.xlu2 %1025 }
 0x261   : > { %v1036_v26 = vsel %vm505_vm0, %v1026_v29, %v2629_v56 }
 0x265   : > { %1159 = vrot.lane.b32.xlu1 %v2541_v4, %s1879_s22 }
 0x267   : > { %v2685_v30 = vpop.permute.xlu1 %957  ;;  %v2687_v31 = vpop.permute.xlu0 %1127 }
 0x268   : > { %v1100_v33 = vpop.permute.xlu2 %1099 }
 0x269   : > { %v2692_v27 = vsel %vm600_vm6, %v1100_v33, %v2641_v10 }
 0x26a   : > { %3377 = vst [vmem:[#allocation13_spill] sm:$0xff] %v2692_v27 }
 0x26f   : > { %v2694_v22 = vpop.permute.xlu1 %1095  ;;  %v1024_v37 = vpop.permute.xlu0 %1023 }
 0x270   : > { %v2700_v38 = vsel %vm600_vm6, %v2694_v22, %v2609_v49  ;;  %v2702_v36 = vpop.permute.xlu2 %995 }
 0x271   : > { %3378 = vst [vmem:[#allocation14_spill] sm:$0xff] %v2700_v38 }
 0x277   : > { %v2704_v58 = vpop.permute.xlu1 %991  ;;  %v2706_v59 = vpop.permute.xlu0 %1097 }
 0x278   : > { %v1134_v47 = vpop.permute.xlu2 %1133 }
 0x279   : > { %v1138_v20 = vsel %vm640_vm5, %v1126_v5, %v1134_v47  ;;  %v2712_v4 = vsel %vm640_vm5, %v1134_v47, %v1126_v5  ;;  %v1136_v5 = vsel %vm640_vm5, %v1122_v52, %v1130_v7 }
 0x27a   : > { %v1149_v60 = vmul.f32 %v1138_v20, %v2265_v13  ;;  %v1135_v20 = vsel %vm640_vm5, %v2583_v40, %v2687_v31  ;;  %v1145_v9 = vmul.f32 %v1136_v5, %v2265_v13 }
 0x27b   : > { %v1143_v52 = vmul.f32 %v1135_v20, %v2265_v13 }
 0x27c   : > { %1244 = vmatpush.msrb.mxu3 %v1149_v60 }
 0x27f   : > { %v2715_v34 = vpop.permute.xlu1 %1065  ;;  %v2717_v41 = vpop.permute.xlu0 %993 }
 0x280   : > { %v2723_v62 = vsel %vm560_vm8, %v2715_v34, %v2631_v57 }
 0x281   : > { %3379 = vst [vmem:[#allocation15_spill] sm:$0xff] %v2723_v62  ;;  %v2740_v62 = vpop.permute.xlu2 %951 }
 0x287   : > { %v2725_v3 = vpop.permute.xlu1 %1131  ;;  %v2727_v25 = vpop.permute.xlu0 %1067 }
 0x288   : > { %v1137_v60 = vsel %vm640_vm5, %v2643_v16, %v2725_v3 }
 0x289   : > { %v1147_v47 = vmul.f32 %v1137_v60, %v2265_v13  ;;  %v2746_v38 = vpop.permute.xlu2 %921 }
 0x28b   : > { %1245 = vmatpush.msrb.mxu3 %v1147_v47 }
 0x28d   : > { %1246 = vmatpush.msrb.mxu3 %v1145_v9 }
 0x28f   : > { %v1028_v7 = vpop.permute.xlu1 %1027  ;;  %v2744_v24 = vpop.permute.xlu0 %963  ;;  %1247 = vmatpush.msrb.mxu3 %v1143_v52  ;;  %v1032_v52 = vsel %vm505_vm0, %v2629_v56, %v1026_v29  ;;  %v1041_v56 = vmul.f32 %v1036_v26, %v2082_v17 }
 0x290   : > { %v1033_v35 = vsel %vm505_vm0, %v1020_v1, %v1028_v7  ;;  %v1037_v47 = vsel %vm505_vm0, %v1028_v7, %v1020_v1 }
 0x291   : > { %v1044_v1 = vmul.f32 %v1033_v35, %v2084_v18  ;;  %v1043_v7 = vmul.f32 %v1037_v47, %v2082_v17  ;;  %v2776_v29 = vpop.permute.xlu2 %1069 }
 0x297   : > { %v2748_v60 = vpop.permute.xlu1 %961  ;;  %v1030_v27 = vpop.permute.xlu0 %1029 }
 0x298   : > { %v1034_v9 = vsel %vm505_vm0, %v1022_v19, %v1030_v27  ;;  %v1038_v13 = vsel %vm505_vm0, %v1030_v27, %v1022_v19  ;;  %v1031_v19 = vsel %vm505_vm0, %v2593_v44, %v1024_v37  ;;  %v1035_v27 = vsel %vm505_vm0, %v1024_v37, %v2593_v44 }
 0x299   : > { %v1046_v5 = vmul.f32 %v1034_v9, %v2084_v18  ;;  %v1045_v20 = vmul.f32 %v1038_v13, %v2082_v17  ;;  %v1042_v9 = vmul.f32 %v1032_v52, %v2084_v18  ;;  %v1040_v35 = vmul.f32 %v1031_v19, %v2084_v18 }
 0x29a   : > { %v1105_v44 = vsel %vm600_vm6, %v2641_v10, %v1100_v33  ;;  %v1104_v37 = vsel %vm600_vm6, %v2601_v46, %v2706_v59  ;;  %v1103_v10 = vsel %vm600_vm6, %v2609_v49, %v2694_v22  ;;  %v1005_v19 = vsel %vm465_vm1, %v2702_v36, %v2651_v0 }
 0x29b   : > { %1215 = vmatpush.msrb.mxu1 %v1045_v20  ;;  %1302 = vmatpush.msra.mxu0 %v1046_v5  ;;  %v1039_v5 = vmul.f32 %v1035_v27, %v2082_v17  ;;  %v1115_v17 = vmul.f32 %v1105_v44, %v2337_v51  ;;  %v1113_v33 = vmul.f32 %v1104_v37, %v2337_v51 }
 0x29c   : > { %v1074_v20 = vsel %vm560_vm8, %v2679_v28, %v2776_v29  ;;  %v1073_v49 = vsel %vm560_vm8, %v2621_v54, %v2727_v25  ;;  %v1072_v44 = vsel %vm560_vm8, %v2631_v57, %v2715_v34  ;;  %v1003_v34 = vsel %vm465_vm1, %v2704_v58, %v2619_v53 }
 0x29d   : > { %1216 = vmatpush.msrb.mxu1 %v1043_v7  ;;  %1303 = vmatpush.msra.mxu0 %v1044_v1  ;;  %v1111_v7 = vmul.f32 %v1103_v10, %v2337_v51  ;;  %v999_v57 = vsel %vm465_vm1, %v2619_v53, %v2704_v58  ;;  %v1007_v53 = vmul.f32 %v1003_v34, %v2124_v42 }
 0x29e   : > { %v1079_v58 = vmul.f32 %v2655_v2, %v2380_v21 }
 0x29f   : > { %v2779_v13 = vpop.permute.xlu1 %1101  ;;  %v2781_v47 = vpop.permute.xlu0 %953  ;;  %1217 = vmatpush.msrb.mxu1 %v1041_v56  ;;  %1304 = vmatpush.msra.mxu0 %v1042_v9 }
 0x2a0   : > { %v1106_v26 = vsel %vm600_vm6, %v2667_v6, %v2779_v13  ;;  %v966_v9 = vpop.permute.xlu2 %965  ;;  %v972_v2 = vsel %vm425_vm2, %v2748_v60, %v2781_v47 }
 0x2a1   : > { %1218 = vmatpush.msrb.mxu1 %v1039_v5  ;;  %1305 = vmatpush.msra.mxu0 %v1040_v35  ;;  %v1117_v18 = vmul.f32 %v1106_v26, %v2337_v51  ;;  %v1001_v51 = vsel %vm465_vm1, %v2651_v0, %v2702_v36  ;;  %v1085_v5 = vmul.f32 %v1074_v20, %v2380_v21 }
 0x2a2   : > { %v1000_v0 = vsel %vm465_vm1, %v2611_v50, %v2717_v41  ;;  %v1011_v36 = vmul.f32 %v1005_v19, %v2124_v42  ;;  %v1083_v26 = vmul.f32 %v1073_v49, %v2380_v21  ;;  %v970_v10 = vsel %vm425_vm2, %v2685_v30, %v966_v9 }
 0x2a3   : > { %1248 = vmatpush.msrb.mxu3 %v1117_v18  ;;  %v1012_v18 = vmul.f32 %v1001_v51, %v2126_v43  ;;  %v1010_v37 = vmul.f32 %v1000_v0, %v2126_v43 }
 0x2a5   : > { %1249 = vmatpush.msrb.mxu3 %v1115_v17  ;;  %v974_v17 = vsel %vm425_vm2, %v966_v9, %v2685_v30  ;;  %v969_v30 = vsel %vm425_vm2, %v2633_v61, %v2744_v24 }
 0x2a6   : > { %v980_v49 = vmul.f32 %v969_v30, %v2164_v8 }
 0x2a7   : > { %v998_v52 = vpop.permute.xlu1 %997  ;;  %v960_v1 = vpop.permute.xlu0 %959  ;;  %1250 = vmatpush.msrb.mxu3 %v1113_v33 }
 0x2a8   : > { %v1002_v22 = vsel %vm465_vm1, %v2681_v23, %v998_v52  ;;  %v1006_v27 = vsel %vm465_vm1, %v998_v52, %v2681_v23  ;;  %v1004_v23 = vsel %vm465_vm1, %v2717_v41, %v2611_v50  ;;  %v1081_v50 = vmul.f32 %v1072_v44, %v2380_v21 }
 0x2a9   : > { %v1014_v56 = vmul.f32 %v1002_v22, %v2126_v43  ;;  %1251 = vmatpush.msrb.mxu3 %v1111_v7  ;;  %v1013_v35 = vmul.f32 %v1006_v27, %v2124_v42  ;;  %v1009_v41 = vmul.f32 %v1004_v23, %v2124_v42  ;;  %v1008_v52 = vmul.f32 %v999_v57, %v2126_v43 }
 0x2aa   : > { %v973_v7 = vsel %vm425_vm2, %v2744_v24, %v2633_v61  ;;  %v981_v42 = vmul.f32 %v974_v17, %v2162_v63  ;;  %v1053_v21 = vmul.f32 %v2521_v55, %v2422_v48  ;;  %v982_v43 = vmul.f32 %v970_v10, %v2164_v8  ;;  %v934_v61 = vpop.permute.xlu2 %933  ;;  %v1183_v10 = vld [vmem:[%s3345_s4] sm:$0xff] }
 0x2ab   : > { %1219 = vmatpush.msrb.mxu1 %v1013_v35  ;;  %1252 = vmatpush.msrb.mxu3 %v1085_v5  ;;  %v968_v24 = vsel %vm425_vm2, %v2781_v47, %v2748_v60  ;;  %v979_v19 = vmul.f32 %v973_v7, %v2162_v63  ;;  %v1051_v55 = vmul.f32 %v2504_v45, %v2422_v48 }
 0x2ac   : > { %1306 = vmatpush.msra.mxu0 %v1014_v56  ;;  %v971_v22 = vsel %vm425_vm2, %v960_v1, %v2740_v62  ;;  %v967_v27 = vsel %vm425_vm2, %v2740_v62, %v960_v1  ;;  %v977_v60 = vmul.f32 %v972_v2, %v2162_v63  ;;  %v1049_v47 = vmul.f32 %v2490_v39, %v2422_v48  ;;  %v2908_v39 = vld [vmem:[%s3345_s4 + $0x8] sm:$0xff] }
 0x2ad   : > { %1220 = vmatpush.msrb.mxu1 %v1011_v36  ;;  %1253 = vmatpush.msrb.mxu3 %v1083_v26  ;;  %v978_v45 = vmul.f32 %v968_v24, %v2164_v8  ;;  %v975_v62 = vmul.f32 %v971_v22, %v2162_v63  ;;  %v1047_v1 = vmul.f32 %v2479_v32, %v2422_v48  ;;  %v2981_v24 = vld [vmem:[%s3345_s4 + $0x50] sm:$0xff] }
 0x2ae   : > { %1307 = vmatpush.msra.mxu0 %v1012_v18  ;;  %v976_v5 = vmul.f32 %v967_v27, %v2164_v8  ;;  %v1110_v7 = vsel %vm600_vm6, %v2779_v13, %v2667_v6  ;;  %v3382_v6 = vld [vmem:[#allocation13_spill] sm:$0xff] }
 0x2af   : > { %v926_v33 = vpop.permute.xlu1 %925  ;;  %v924_v20 = vpop.permute.xlu0 %923  ;;  %1221 = vmatpush.msrb.mxu1 %v1009_v41  ;;  %1254 = vmatpush.msrb.mxu3 %v1081_v50  ;;  %v2931_v41 = vld [vmem:[%s3345_s4 + $0x20] sm:$0xff] }
 0x2b0   : > { %1308 = vmatpush.msra.mxu0 %v1010_v37  ;;  %v942_v51 = vsel %vm386_vm4, %v934_v61, %v926_v33  ;;  %v938_v9 = vsel %vm386_vm4, %v926_v33, %v934_v61  ;;  %v1141_v33 = vsel %vm640_vm5, %v2725_v3, %v2643_v16  ;;  %v3380_v16 = vld [vmem:[#allocation12_spill] sm:$0xff] }
 0x2b1   : > { %1222 = vmatpush.msrb.mxu1 %v1007_v53  ;;  %1255 = vmatpush.msrb.mxu3 %v1079_v58  ;;  %v949_v63 = vmul.f32 %v942_v51, %v2260_v11  ;;  %v950_v48 = vmul.f32 %v938_v9, %v2262_v12  ;;  %v1146_v3 = vmul.f32 %v3380_v16, %v2267_v15  ;;  %v1191_v16 = vld [vmem:[%s3345_s4 + $0x40] sm:$0xff] }
 0x2b2   : > { %1309 = vmatpush.msra.mxu0 %v1008_v52  ;;  %v928_v26 = vpop.permute.xlu2 %927  ;;  %v1077_v51 = vsel %vm560_vm8, %v2727_v25, %v2621_v54 }
 0x2b3   : > { %1223 = vmatpush.msrb.mxu1 %v981_v42  ;;  %1256 = vmatpush.msrb.mxu3 %v1053_v21  ;;  %v1108_v21 = vsel %vm600_vm6, %v2706_v59, %v2601_v46  ;;  %v1078_v46 = vsel %vm560_vm8, %v2776_v29, %v2679_v28  ;;  %v1189_v29 = vld [vmem:[%s3345_s4 + $0x30] sm:$0xff] }
 0x2b4   : > { %1310 = vmatpush.msra.mxu0 %v982_v43 }
 0x2b5   : > { %1224 = vmatpush.msrb.mxu1 %v979_v19  ;;  %1257 = vmatpush.msrb.mxu3 %v1051_v55  ;;  %v3383_v55 = vld [vmem:[#allocation14_spill] sm:$0xff] }
 0x2b6   : > { %1311 = vmatpush.msra.mxu0 %v980_v49 }
 0x2b7   : > { %v932_v56 = vpop.permute.xlu1 %931  ;;  %v930_v35 = vpop.permute.xlu0 %929  ;;  %1225 = vmatpush.msrb.mxu1 %v977_v60  ;;  %1258 = vmatpush.msrb.mxu3 %v1049_v47  ;;  %v3384_v60 = vld [vmem:[#allocation2_spill] sm:$0xff] }
 0x2b8   : > { %v941_v44 = vsel %vm386_vm4, %v932_v56, %v924_v20  ;;  %1312 = vmatpush.msra.mxu0 %v978_v45  ;;  %v937_v23 = vsel %vm386_vm4, %v924_v20, %v932_v56  ;;  %v940_v32 = vsel %vm386_vm4, %v930_v35, %v2746_v38  ;;  %v936_v8 = vsel %vm386_vm4, %v2746_v38, %v930_v35  ;;  %v3385_v45 = vld [vmem:[#allocation3_spill] sm:$0xff]  ;;  %v3386_v56 = vld [vmem:[#allocation5_spill] sm:$0xff] }
 0x2b9   : > { %1226 = vmatpush.msrb.mxu1 %v975_v62  ;;  %1259 = vmatpush.msrb.mxu3 %v1047_v1  ;;  %v947_v0 = vmul.f32 %v941_v44, %v2260_v11  ;;  %v948_v36 = vmul.f32 %v937_v23, %v2262_v12  ;;  %v945_v18 = vmul.f32 %v940_v32, %v2260_v11  ;;  %v3387_v23 = vld [vmem:[#allocation15_spill] sm:$0xff] }
 0x2ba   : > { %1313 = vmatpush.msra.mxu0 %v976_v5  ;;  %1260 = vmatmul.f32.vlgmr.msrb.gmra.mxu3 %v2908_v39  ;;  %v946_v34 = vmul.f32 %v936_v8, %v2262_v12  ;;  %v1150_v20 = vmul.f32 %v2712_v4, %v2267_v15  ;;  %v1156_v58 = vpop.permute.xlu2 %1155  ;;  %v2959_v4 = vld [vmem:[%s3345_s4 + $0x38] sm:$0xff]  ;;  %v1086_v35 = vmul.f32 %v1078_v46, %v3386_v56 }
 0x2bb   : > { %1227 = vmatpush.msrb.mxu1 %v949_v63  ;;  %v1084_v25 = vmul.f32 %v1077_v51, %v3386_v56  ;;  %v1082_v63 = vmul.f32 %v3387_v23, %v3386_v56 }
 0x2bc   : > { %1314 = vmatpush.msra.mxu0 %v950_v48 }
 0x2bd   : > { %1228 = vmatpush.msrb.mxu1 %v947_v0 }
 0x2be   : > { %1315 = vmatpush.msra.mxu0 %v948_v36  ;;  %v3388_v36 = vld [vmem:[#allocation11_spill] sm:$0xff] }
 0x2bf   : > { %v920_v57 = vpop.permute.xlu1 %919  ;;  %1229 = vmatpush.msrb.mxu1 %v945_v18  ;;  %v1158_v53 = vpop.permute.xlu0 %1157 }
 0x2c0   : > { %v935_v38 = vsel %vm386_vm4, %v920_v57, %v928_v26  ;;  %v939_v50 = vsel %vm386_vm4, %v928_v26, %v920_v57  ;;  %1316 = vmatpush.msra.mxu0 %v946_v34  ;;  %v1080_v26 = vmul.f32 %v3388_v36, %v3386_v56  ;;  %v1192_v57 = vld [vmem:[%s3345_s4 + $0x48] sm:$0xff] }
 0x2c1   : > { %v944_v37 = vmul.f32 %v935_v38, %v2262_v12  ;;  %v943_v17 = vmul.f32 %v939_v50, %v2260_v11  ;;  %v1148_v11 = vmul.f32 %v1141_v33, %v2267_v15  ;;  %v1139_v12 = vsel %vm640_vm5, %v2687_v31, %v2583_v40  ;;  %v1186_v40 = vld [vmem:[%s3345_s4 + $0x18] sm:$0xff]  ;;  %v3381_v31 = vld [vmem:[#allocation4_spill] sm:$0xff]  ;;  %v3390_v50 = vld [vmem:[#allocation10_spill] sm:$0xff] }
 0x2c2   : > { %1263 = vmatmul.f32.gmra.mxu3 %v2931_v41  ;;  %v1144_v30 = vmul.f32 %v1139_v12, %v2267_v15  ;;  %v1118_v42 = vmul.f32 %v1110_v7, %v3381_v31  ;;  %v1116_v15 = vmul.f32 %v3382_v6, %v3381_v31  ;;  %v1114_v43 = vmul.f32 %v1108_v21, %v3381_v31  ;;  %v1162_v22 = vpop.permute.xlu2 %1161  ;;  %v1185_v38 = vld [vmem:[%s3345_s4 + $0x10] sm:$0xff]  ;;  %v1188_v12 = vld [vmem:[%s3345_s4 + $0x28] sm:$0xff] }
 0x2c3   : > { %1230 = vmatpush.msrb.mxu1 %v943_v17  ;;  %1317 = vmatpush.msra.mxu0 %v944_v37  ;;  %v1112_v49 = vmul.f32 %v3383_v55, %v3381_v31  ;;  %v1054_v37 = vmul.f32 %v3390_v50, %v3389_v14  ;;  %v3391_v17 = vld [vmem:[#allocation9_spill] sm:$0xff]  ;;  %v3392_v33 = vld [vmem:[#allocation8_spill] sm:$0xff] }
 0x2c4   : > { %1231 = vmatmul.f32.vlgmr.msrb.gmra.mxu1 %v1183_v10  ;;  %1318 = vmatmul.f32.vlgmr.msra.gmra.mxu0 %v1183_v10  ;;  %v1052_v10 = vmul.f32 %v3391_v17, %v3389_v14 }
 0x2c5   : > { %1331 = vmatpush.msra.mxu1 %v1150_v20  ;;  %v1050_v20 = vmul.f32 %v3392_v33, %v3389_v14 }
 0x2c7   : > { %1332 = vmatpush.msra.mxu1 %v1148_v11  ;;  %v1154_v52 = vpop.permute.xlu1 %1153  ;;  %v1164_v13 = vpop.permute.xlu0 %1163 }
 0x2c8   : > { %v1169_v59 = vsel %vm680_vm3, %v1156_v58, %v1164_v13  ;;  %v1173_v27 = vsel %vm680_vm3, %v1164_v13, %v1156_v58  ;;  %v1168_v9 = vsel %vm680_vm3, %v1154_v52, %v1162_v22  ;;  %v1172_v62 = vsel %vm680_vm3, %v1162_v22, %v1154_v52  ;;  %v1200_v22 = vld [vmem:[%s3346_s5 + $0x28] sm:$0xff] }
 0x2c9   : > { %1333 = vmatpush.msra.mxu1 %v1146_v3  ;;  %v1179_v1 = vmul.f32 %v1169_v59, %v3384_v60  ;;  %v1180_v5 = vmul.f32 %v1173_v27, %v3385_v45  ;;  %v1177_v54 = vmul.f32 %v1168_v9, %v3384_v60  ;;  %v1178_v44 = vmul.f32 %v1172_v62, %v3385_v45  ;;  %v1194_v3 = vld [vmem:[%s3345_s4 + $0x58] sm:$0xff] }
 0x2ca   : > { %1266 = vmatmul.f32.gmra.mxu3 %v2959_v4  ;;  %v1198_v59 = vld [vmem:[%s3346_s5 + $0x18] sm:$0xff]  ;;  %v1884_v27 = vmov 32.0  }
 0x2cb   : > { %1334 = vmatpush.msra.mxu1 %v1144_v30  ;;  %1826 = vrcp.f32 %v1884_v27 }
 0x2cc   : > { %1234 = vmatmul.f32.gmra.mxu1 %v1186_v40  ;;  %1321 = vmatmul.f32.gmra.mxu0 %v1186_v40 }
 0x2cd   : > { %1335 = vmatpush.msra.mxu1 %v1118_v42 }
 0x2cf   : > { %1336 = vmatpush.msra.mxu1 %v1116_v15  ;;  %v1166_v2 = vpop.permute.xlu1 %1165  ;;  %v1152_v48 = vpop.permute.xlu0 %1151 }
 0x2d0   : > { %v1170_v61 = vsel %vm680_vm3, %v1158_v53, %v1166_v2  ;;  %v1174_v19 = vsel %vm680_vm3, %v1166_v2, %v1158_v53  ;;  %v3393_v53 = vld [vmem:[#allocation7_spill] sm:$0xff] }
 0x2d1   : > { %v1181_v47 = vmul.f32 %v1170_v61, %v3384_v60  ;;  %v1182_v28 = vmul.f32 %v1174_v19, %v3385_v45  ;;  %1337 = vmatpush.msra.mxu1 %v1114_v43  ;;  %v1048_v11 = vmul.f32 %v3393_v53, %v3389_v14  ;;  %v1195_v61 = vld [vmem:[%s3346_s5] sm:$0xff] }
 0x2d2   : > { %1269 = vmatmul.f32.gmra.mxu3 %v2981_v24  ;;  %v1199_v19 = vld [vmem:[%s3346_s5 + $0x20] sm:$0xff] }
 0x2d3   : > { %1338 = vmatpush.msra.mxu1 %v1112_v49  ;;  %1285 = vmatpush.msra.mxu2 %v1181_v47  ;;  %v1196_v49 = vld [vmem:[%s3346_s5 + $0x8] sm:$0xff] }
 0x2d4   : > { %1372 = vmatpush.msra.mxu3 %v1182_v28  ;;  %1237 = vmatmul.f32.gmra.mxu1 %v1189_v29  ;;  %v1201_v28 = vld [vmem:[%s3346_s5 + $0x30] sm:$0xff] }
 0x2d5   : > { %1339 = vmatpush.msra.mxu1 %v1086_v35  ;;  %1286 = vmatpush.msra.mxu2 %v1179_v1 }
 0x2d6   : > { %1373 = vmatpush.msra.mxu3 %v1180_v5  ;;  %1324 = vmatmul.f32.gmra.mxu0 %v1189_v29  ;;  %v1827_v5 = vpop.eup %1826 }
 0x2d7   : > { %1340 = vmatpush.msra.mxu1 %v1084_v25  ;;  %v1160_v32 = vpop.permute.xlu1 %1159  ;;  %1287 = vmatpush.msra.mxu2 %v1177_v54  ;;  %vm1412_vm9 = vweird.f32 %v1827_v5 }
 0x2d8   : > { %v1167_v8 = vsel %vm680_vm3, %v1152_v48, %v1160_v32  ;;  %v1171_v0 = vsel %vm680_vm3, %v1160_v32, %v1152_v48  ;;  %1374 = vmatpush.msra.mxu3 %v1178_v44 }
 0x2d9   : > { %v1175_v18 = vmul.f32 %v1167_v8, %v3384_v60  ;;  %v1176_v34 = vmul.f32 %v1171_v0, %v3385_v45  ;;  %1341 = vmatpush.msra.mxu1 %v1082_v63  ;;  %v1202_v63 = vld [vmem:[%s3346_s5 + $0x38] sm:$0xff] }
 0x2db   : > { %1342 = vmatpush.msra.mxu1 %v1080_v26  ;;  %1288 = vmatpush.msra.mxu2 %v1175_v18  ;;  %v1408_v18 = vmul.f32 32.0, %v1827_v5 }
 0x2dc   : > { %1375 = vmatpush.msra.mxu3 %v1176_v34  ;;  %1240 = vmatmul.f32.gmra.mxu1 %v1192_v57 }
 0x2dd   : > { %1779 = vmatmul.msk.f32.vlgmr.msra.gmra.mxu2 %vm724_vm7, %v1185_v38  ;;  %1343 = vmatpush.msra.mxu1 %v1054_v37 }
 0x2de   : > { %1783 = vmatmul.msk.f32.vlgmr.msra.gmra.mxu3 %vm724_vm7, %v1185_v38  ;;  %1327 = vmatmul.f32.gmra.mxu0 %v1192_v57 }
 0x2df   : > { %1344 = vmatpush.msra.mxu1 %v1052_v10 }
 0x2e1   : > { %1345 = vmatpush.msra.mxu1 %v1050_v20 }
 0x2e3   : > { %1346 = vmatpush.msra.mxu1 %v1048_v11  ;;  %v1409_v11 = vsub.f32 1.0, %v1408_v18  ;;  %v1789_v18 = vld [vmem:[%s3349_s8 + $0x40] sm:$0xff] }
 0x2e4   : > { %1347 = vmatmul.f32.vlgmr.msra.gmra.mxu1 %v2908_v39 }
 0x2e5   : > { %1780 = vmatmul.msk.f32.gmra.mxu2 %vm724_vm7, %v1188_v12 }
 0x2e6   : > { %1784 = vmatmul.msk.f32.gmra.mxu3 %vm724_vm7, %v1188_v12 }
 0x2ec   : > { %1350 = vmatmul.f32.gmra.mxu1 %v2931_v41 }
 0x2ed   : > { %1781 = vmatmul.msk.f32.gmra.mxu2 %vm724_vm7, %v1191_v16 }
 0x2ee   : > { %1785 = vmatmul.msk.f32.gmra.mxu3 %vm724_vm7, %v1191_v16 }
 0x2f4   : > { %1353 = vmatmul.f32.gmra.mxu1 %v2959_v4 }
 0x2f5   : > { %1782 = vmatmul.msk.f32.gmra.mxu2 %vm724_vm7, %v1194_v3 }
 0x2f6   : > { %1786 = vmatmul.msk.f32.gmra.mxu3 %vm724_vm7, %v1194_v3 }
 0x2fc   : > { %1356 = vmatmul.f32.gmra.mxu1 %v2981_v24  ;;  %v1197_v24 = vld [vmem:[%s3346_s5 + $0x10] sm:$0xff] }
 0x33d   : > { %v1261_v39 = vpop.f32.mrf.mxu3 }
 0x341   : > { %v1232_v58 = vpop.f32.mrf.mxu1  ;;  %v1319_v40 = vpop.f32.mrf.mxu0 }
 0x342   : > { %v1233_v47 = vadd.f32 %v1232_v58, %v1195_v61  ;;  %v1320_v29 = vadd.f32 %v1319_v40, %v1196_v49 }
 0x344   : > { %v1262_v25 = vadd.f32 %v1261_v39, %v1233_v47 }
 0x345   : > { %v1264_v52 = vpop.f32.mrf.mxu3 }
 0x349   : > { %v1235_v41 = vpop.f32.mrf.mxu1  ;;  %v1322_v21 = vpop.f32.mrf.mxu0 }
 0x34a   : > { %v1236_v55 = vadd.f32 %v1235_v41, %v1197_v24  ;;  %v1323_v60 = vadd.f32 %v1322_v21, %v1198_v59 }
 0x34c   : > { %v1265_v56 = vadd.f32 %v1264_v52, %v1236_v55  ;;  %v1410_v52 = vmul.f32 %v1827_v5, %v1409_v11  ;;  %v1420_v11 = vld [vmem:[%s3350_s9 + $0x20] sm:$0xff] }
 0x34d   : > { %v1267_v7 = vpop.f32.mrf.mxu3 }
 0x351   : > { %v1238_v30 = vpop.f32.mrf.mxu1 }
 0x352   : > { %v1239_v45 = vadd.f32 %v1238_v30, %v1199_v19 }
 0x353   : > { %v1325_v43 = vpop.f32.mrf.mxu0 }
 0x354   : > { %v1326_v9 = vadd.f32 %v1325_v43, %v1200_v22  ;;  %v1268_v54 = vadd.f32 %v1267_v7, %v1239_v45 }
 0x355   : > { %v1270_v31 = vpop.f32.mrf.mxu3 }
 0x359   : > { %v1241_v42 = vpop.f32.mrf.mxu1 }
 0x35a   : > { %v1242_v44 = vadd.f32 %v1241_v42, %v1201_v28 }
 0x35b   : > { %v1328_v48 = vpop.f32.mrf.mxu0 }
 0x35c   : > { %v1329_v34 = vadd.f32 %v1328_v48, %v1202_v63  ;;  %v1271_v57 = vadd.f32 %v1270_v31, %v1242_v44  ;;  %v1411_v31 = vadd.f32 %v1827_v5, %v1410_v52  ;;  %v1444_v44 = vld [vmem:[%s3349_s8 + $0x10] sm:$0xff]  ;;  %v1416_v48 = vld [vmem:[%s3350_s9] sm:$0xff] }
 0x35e   : > { %v1413_v43 = vsel %vm1412_vm9, %v1827_v5, %v1411_v31 }
 0x360   : > { %v1290_v6 = vpop.f32.mrf.mxu2 }
 0x361   : > { %v1348_v15 = vpop.f32.mrf.mxu1  ;;  %v1377_v13 = vpop.f32.mrf.mxu3  ;;  %v3088_v0 = vadd.f32 %v1290_v6, %v1262_v25  ;;  %v1424_v6 = vld [vmem:[%s3347_s6] ss:$2 sm:$0x3] }
 0x362   : > { %v1349_v32 = vadd.f32 %v1348_v15, %v1320_v29  ;;  %v1787_v15 = vld [vmem:[%s3347_s6 + $0x1] ss:$2 sm:$0x3]  ;;  %v1426_v61 = vperm.slane %v1424_v6, 0  ;;  %v1427_v47 = vperm.slane %v1424_v6, 1 }
 0x363   : > { %v1471_v19 = vperm.slane %v1787_v15, 0  ;;  %v1472_v45 = vperm.slane %v1787_v15, 1 }
 0x364   : > { %v3096_v14 = vadd.f32 %v1377_v13, %v1349_v32  ;;  %v1446_v32 = vld [vmem:[%s3349_s8 + $0x20] sm:$0xff] }
 0x368   : > { %v1293_v4 = vpop.f32.mrf.mxu2 }
 0x369   : > { %v1351_v2 = vpop.f32.mrf.mxu1  ;;  %v1380_v46 = vpop.f32.mrf.mxu3  ;;  %v3083_v23 = vadd.f32 %v1293_v4, %v1265_v56 }
 0x36a   : > { %v1352_v1 = vadd.f32 %v1351_v2, %v1323_v60  ;;  %v1432_v2 = vld [vmem:[%s3348_s7] ss:$2 sm:$0x3] }
 0x36b   : > { %v1389_v38 = vadd.f32 %v3083_v23, %v3088_v0  ;;  %v1434_v22 = vperm.slane %v1432_v2, 0 }
 0x36c   : > { %v3092_v26 = vadd.f32 %v1380_v46, %v1352_v1  ;;  %v1788_v46 = vld [vmem:[%s3348_s7 + $0x1] ss:$2 sm:$0x3] }
 0x36d   : > { %v1480_v27 = vperm.slane %v1788_v46, 0  ;;  %v1481_v56 = vperm.slane %v1788_v46, 1  ;;  %v1449_v46 = vld [vmem:[%s3349_s8 + $0x38] sm:$0xff] }
 0x36e   : > { %v1398_v53 = vadd.f32 %v3092_v26, %v3096_v14 }
 0x370   : > { %v1296_v51 = vpop.f32.mrf.mxu2 }
 0x371   : > { %v1354_v35 = vpop.f32.mrf.mxu1  ;;  %v1383_v62 = vpop.f32.mrf.mxu3  ;;  %v3090_v36 = vadd.f32 %v1296_v51, %v1268_v54  ;;  %v1442_v54 = vld [vmem:[%s3349_s8] sm:$0xff] }
 0x372   : > { %v1355_v8 = vadd.f32 %v1354_v35, %v1326_v9  ;;  %v1435_v9 = vperm.slane %v1432_v2, 1  ;;  %v1447_v2 = vld [vmem:[%s3349_s8 + $0x28] sm:$0xff] }
 0x373   : > { %v1390_v17 = vadd.f32 %v1389_v38, %v3090_v36 }
 0x374   : > { %v3098_v50 = vadd.f32 %v1383_v62, %v1355_v8  ;;  %v1448_v8 = vld [vmem:[%s3349_s8 + $0x30] sm:$0xff] }
 0x376   : > { %v1399_v3 = vadd.f32 %v1398_v53, %v3098_v50  ;;  %v1418_v53 = vld [vmem:[%s3350_s9 + $0x10] sm:$0xff] }
 0x378   : > { %v1299_v37 = vpop.f32.mrf.mxu2 }
 0x379   : > { %v3101_v10 = vadd.f32 %v1299_v37, %v1271_v57  ;;  %v1357_v33 = vpop.f32.mrf.mxu1  ;;  %v1386_v20 = vpop.f32.mrf.mxu3  ;;  %v1791_v37 = vld [vmem:[%s3349_s8 + $0x50] sm:$0xff] }
 0x37a   : > { %v1358_v12 = vadd.f32 %v1357_v33, %v1329_v34  ;;  %v1795_v33 = vld [vmem:[%s3349_s8 + $0x70] sm:$0xff] }
 0x37b   : > { %v1391_v16 = vadd.f32 %v1390_v17, %v3101_v10  ;;  %v1793_v17 = vld [vmem:[%s3349_s8 + $0x60] sm:$0xff] }
 0x37c   : > { %v3107_v39 = vadd.f32 %v1386_v20, %v1358_v12  ;;  %v1422_v12 = vld [vmem:[%s3350_s9 + $0x30] sm:$0xff] }
 0x37d   : > { %v1392_v58 = vrot.slane %v1391_v16, 4 }
 0x37e   : > { %v1400_v41 = vadd.f32 %v1399_v3, %v3107_v39 }
 0x37f   : > { %v1393_v7 = vadd.f32 %v1392_v58, %v1391_v16 }
 0x380   : > { %v1401_v30 = vrot.slane %v1400_v41, 4 }
 0x381   : > { %v1394_v40 = vrot.slane %v1393_v7, 2 }
 0x382   : > { %v1402_v42 = vadd.f32 %v1401_v30, %v1400_v41 }
 0x383   : > { %v1395_v21 = vadd.f32 %v1394_v40, %v1393_v7 }
 0x384   : > { %v1403_v13 = vrot.slane %v1402_v42, 2 }
 0x385   : > { %v1396_v4 = vrot.slane %v1395_v21, 1 }
 0x386   : > { %v1404_v24 = vadd.f32 %v1403_v13, %v1402_v42 }
 0x387   : > { %v1397_v59 = vadd.f32 %v1396_v4, %v1395_v21  ;;  %v1443_v21 = vld [vmem:[%s3349_s8 + $0x8] sm:$0xff] }
 0x388   : > { %v1405_v55 = vrot.slane %v1404_v24, 1 }
 0x389   : > { %v1414_v49 = vmul.f32 %v1413_v43, %v1397_v59  ;;  %v1790_v59 = vld [vmem:[%s3349_s8 + $0x48] sm:$0xff] }
 0x38a   : > { %v1406_v60 = vadd.f32 %v1405_v55, %v1404_v24 }
 0x38b   : > { %v1430_v28 = vmul.f32 %v1426_v61, %v1414_v49  ;;  %v1475_v29 = vmul.f32 %v1471_v19, %v1414_v49  ;;  %v1792_v61 = vld [vmem:[%s3349_s8 + $0x58] sm:$0xff] }
 0x38c   : > { %v1415_v51 = vmul.f32 %v1413_v43, %v1406_v60  ;;  %v1445_v43 = vld [vmem:[%s3349_s8 + $0x18] sm:$0xff]  ;;  %v1417_v60 = vld [vmem:[%s3350_s9 + $0x8] sm:$0xff] }
 0x38d   : > { %v1438_v35 = vadd.f32 %v1434_v22, %v1430_v28  ;;  %v1484_v62 = vadd.f32 %v1480_v27, %v1475_v29  ;;  %v1423_v28 = vld [vmem:[%s3350_s9 + $0x38] sm:$0xff] }
 0x38e   : > { %v1431_v1 = vmul.f32 %v1427_v47, %v1415_v51  ;;  %v1476_v5 = vmul.f32 %v1472_v45, %v1415_v51  ;;  %v1419_v47 = vld [vmem:[%s3350_s9 + $0x18] sm:$0xff]  ;;  %v1421_v45 = vld [vmem:[%s3350_s9 + $0x28] sm:$0xff] }
 0x38f   : > { %v1440_v25 = vmax.f32 %v1438_v35, 0.0  ;;  %v1486_v63 = vmax.f32 %v1484_v62, 0.0  ;;  %v1794_v35 = vld [vmem:[%s3349_s8 + $0x68] sm:$0xff]  ;;  %v1796_v62 = vld [vmem:[%s3349_s8 + $0x78] sm:$0xff] }
 0x390   : > { %v1439_v34 = vadd.f32 %v1435_v9, %v1431_v1  ;;  %v1485_v57 = vadd.f32 %v1481_v56, %v1476_v5 }
 0x391   : > { %v1450_v38 = vperm.slane %v1440_v25, 0  ;;  %v1497_v20 = vperm.slane %v1486_v63, 0 }
 0x392   : > { %v1441_v16 = vmax.f32 %v1439_v34, 0.0  ;;  %v1487_v3 = vmax.f32 %v1485_v57, 0.0 }
 0x393   : > { %v1452_v58 = vmul.f32 %v1450_v38, %v1442_v54  ;;  %v1454_v52 = vmul.f32 %v1450_v38, %v1444_v44  ;;  %v1456_v41 = vmul.f32 %v1450_v38, %v1446_v32  ;;  %v1458_v7 = vmul.f32 %v1450_v38, %v1448_v8 }
 0x394   : > { %v1499_v30 = vmul.f32 %v1789_v18, %v1497_v20  ;;  %v1501_v40 = vmul.f32 %v1791_v37, %v1497_v20  ;;  %v1503_v31 = vmul.f32 %v1793_v17, %v1497_v20  ;;  %v1505_v42 = vmul.f32 %v1795_v33, %v1497_v20 }
 0x395   : > { %v1460_v6 = vadd.f32 %v1452_v58, %v1416_v48  ;;  %v1462_v15 = vadd.f32 %v1454_v52, %v1418_v53  ;;  %v1464_v13 = vadd.f32 %v1456_v41, %v1420_v11  ;;  %v1466_v4 = vadd.f32 %v1458_v7, %v1422_v12 }
 0x396   : > { %v1451_v24 = vperm.slane %v1441_v16, 0  ;;  %v1498_v19 = vperm.slane %v1487_v3, 0 }
 0x397   : > { %v1507_v55 = vadd.f32 %v1499_v30, %v1460_v6  ;;  %v1509_v49 = vadd.f32 %v1501_v40, %v1462_v15  ;;  %v1511_v22 = vadd.f32 %v1503_v31, %v1464_v13  ;;  %v1513_v27 = vadd.f32 %v1505_v42, %v1466_v4 }
 0x398   : > { %v1453_v29 = vmul.f32 %v1451_v24, %v1443_v21  ;;  %v1455_v51 = vmul.f32 %v1451_v24, %v1445_v43  ;;  %v1457_v9 = vmul.f32 %v1451_v24, %v1447_v2  ;;  %v1459_v56 = vmul.f32 %v1451_v24, %v1449_v46 }
 0x399   : > { %v1797_v1 = vmul.f32 -1.442695, %v1507_v55  ;;  %v1799_v5 = vmul.f32 -1.442695, %v1509_v49  ;;  %v1801_v25 = vmul.f32 -1.442695, %v1511_v22  ;;  %v1500_v54 = vmul.f32 %v1790_v59, %v1498_v19 }
 0x39a   : > { %v1803_v44 = vmul.f32 -1.442695, %v1513_v27  ;;  %v1461_v63 = vadd.f32 %v1453_v29, %v1417_v60  ;;  %v1463_v48 = vadd.f32 %v1455_v51, %v1419_v47  ;;  %v1465_v32 = vadd.f32 %v1457_v9, %v1421_v45 }
 0x39b   : > { %1828 = vpow2.f32 %v1797_v1  ;;  %v1467_v8 = vadd.f32 %v1459_v56, %v1423_v28  ;;  %v1502_v18 = vmul.f32 %v1792_v61, %v1498_v19  ;;  %v1504_v34 = vmul.f32 %v1794_v35, %v1498_v19 }
 0x39c   : > { %1830 = vpow2.f32 %v1799_v5  ;;  %v1506_v57 = vmul.f32 %v1796_v62, %v1498_v19  ;;  %v1508_v38 = vadd.f32 %v1500_v54, %v1461_v63 }
 0x39d   : > { %1832 = vpow2.f32 %v1801_v25  ;;  %v1510_v37 = vadd.f32 %v1502_v18, %v1463_v48  ;;  %v1512_v17 = vadd.f32 %v1504_v34, %v1465_v32 }
 0x39e   : > { %1834 = vpow2.f32 %v1803_v44  ;;  %v1514_v33 = vadd.f32 %v1506_v57, %v1467_v8  ;;  %v1798_v20 = vmul.f32 -1.442695, %v1508_v38 }
 0x39f   : > { %v1800_v53 = vmul.f32 -1.442695, %v1510_v37  ;;  %v1802_v11 = vmul.f32 -1.442695, %v1512_v17 }
 0x3a0   : > { %1836 = vpow2.f32 %v1798_v20  ;;  %v1804_v12 = vmul.f32 -1.442695, %v1514_v33 }
 0x3a1   : > { %v1829_v16 = vpop.eup %1828  ;;  %1838 = vpow2.f32 %v1800_v53 }
 0x3a2   : > { %v1831_v3 = vpop.eup %1830  ;;  %v3194_v58 = vadd.f32 1.0, %v1829_v16  ;;  %1840 = vpow2.f32 %v1802_v11 }
 0x3a3   : > { %v1833_v52 = vpop.eup %1832  ;;  %v3196_v41 = vadd.f32 1.0, %v1831_v3  ;;  %1842 = vpow2.f32 %v1804_v12 }
 0x3a4   : > { %v1835_v7 = vpop.eup %1834  ;;  %v3198_v30 = vadd.f32 1.0, %v1833_v52  ;;  %1844 = vrcp.f32 %v3194_v58  ;;  %v1558_v42 = vand.u32 2147483648, %v3194_v58  ;;  %v1556_v6 = vand.u32 2147483647, %v3194_v58 }
 0x3a5   : > { %v3201_v40 = vadd.f32 1.0, %v1835_v7  ;;  %1846 = vrcp.f32 %v3196_v41  ;;  %v1586_v13 = vand.u32 2147483647, %v3196_v41  ;;  %v1588_v4 = vand.u32 2147483648, %v3196_v41 }
 0x3a6   : > { %v1837_v31 = vpop.eup %1836  ;;  %1848 = vrcp.f32 %v3198_v30  ;;  %v1618_v43 = vand.u32 2147483648, %v3198_v30  ;;  %vm1552_vm10 = vweird.f32 %v3194_v58  ;;  %v1616_v46 = vand.u32 2147483647, %v3198_v30 }
 0x3a7   : > { %v1839_v21 = vpop.eup %1838  ;;  %1850 = vrcp.f32 %v3201_v40  ;;  %v1559_v59 = vor.u32 1.1754944e-38, %v1558_v42  ;;  %vm1582_vm11 = vweird.f32 %v3196_v41  ;;  %v3214_v61 = vadd.f32 1.0, %v1837_v31 }
 0x3a8   : > { %v1841_v15 = vpop.eup %1840  ;;  %v3216_v19 = vadd.f32 1.0, %v1839_v21  ;;  %vm3219_vm12 = vcmp.eq.f32.partialorder %v1556_v6, 8.507059e+37  ;;  %vm1612_vm13 = vweird.f32 %v3198_v30  ;;  %v1646_v27 = vand.u32 2147483647, %v3201_v40 }
 0x3a9   : > { %v1843_v2 = vpop.eup %1842  ;;  %v1648_v60 = vand.u32 2147483648, %v3201_v40  ;;  %vm3227_vm14 = vcmp.eq.f32.partialorder %v1586_v13, 8.507059e+37  ;;  %v1589_v29 = vor.u32 1.1754944e-38, %v1588_v4  ;;  %v1619_v51 = vor.u32 1.1754944e-38, %v1618_v43 }
 0x3aa   : > { %v1845_v24 = vpop.eup %1844  ;;  %1852 = vrcp.f32 %v3214_v61  ;;  %vm3233_vm15 = vcmp.eq.f32.partialorder %v1616_v46, 8.507059e+37  ;;  %vm1642_vm0 = vweird.f32 %v3201_v40  ;;  %v3238_v62 = vadd.f32 1.0, %v1841_v15 }
 0x3ab   : > { %v1847_v55 = vpop.eup %1846  ;;  %v1548_v49 = vmul.f32 %v1845_v24, %v3194_v58  ;;  %v3240_v1 = vadd.f32 1.0, %v1843_v2  ;;  %vm1553_vm1 = vweird.f32 %v1845_v24  ;;  %v1573_v54 = vand.u32 2147483648, %v3214_v61 }
 0x3ac   : > { %v1849_v47 = vpop.eup %1848  ;;  %v1578_v45 = vmul.f32 %v1847_v55, %v3196_v41  ;;  %1854 = vrcp.f32 %v3216_v19  ;;  %vm3245_vm2 = vcmp.eq.f32.partialorder %v1646_v27, 8.507059e+37  ;;  %v1649_v8 = vor.u32 1.1754944e-38, %v1648_v60  ;;  %vm1554_vm6 = vmor %vm1552_vm10, %vm1553_vm1  ;;  %v1862_v60 = vld [vmem:[%s1956_s18 + $0x20] sm:$0xff] }
 0x3ad   : > { %v1549_v9 = vsub.f32 1.0, %v1548_v49  ;;  %v1608_v56 = vmul.f32 %v1849_v47, %v3198_v30  ;;  %v1851_v5 = vpop.eup %1850  ;;  %vm1583_vm3 = vweird.f32 %v1847_v55  ;;  %vm1613_vm4 = vweird.f32 %v1849_v47 }
 0x3ae   : > { %v1579_v25 = vsub.f32 1.0, %v1578_v45  ;;  %v1638_v48 = vmul.f32 %v1851_v5, %v3201_v40  ;;  %v1571_v34 = vand.u32 2147483647, %v3214_v61  ;;  %vm1643_vm5 = vweird.f32 %v1851_v5  ;;  %vm1584_vm8 = vmor %vm1582_vm11, %vm1583_vm3  ;;  %v1861_v40 = vld [vmem:[%s1956_s18 + $0x10] sm:$0xff] }
 0x3af   : > { %v1550_v44 = vmul.f32 %v1845_v24, %v1549_v9  ;;  %v1609_v63 = vsub.f32 1.0, %v1608_v56  ;;  %vm1567_vm7 = vweird.f32 %v3214_v61  ;;  %v1574_v20 = vor.u32 1.1754944e-38, %v1573_v54  ;;  %vm1614_vm9 = vmor %vm1612_vm13, %vm1613_vm4  ;;  %v1863_v56 = vld [vmem:[%s1956_s18 + $0x30] sm:$0xff] }
 0x3b0   : > { %v1580_v18 = vmul.f32 %v1847_v55, %v1579_v25  ;;  %v1639_v37 = vsub.f32 1.0, %v1638_v48  ;;  %v3250_v17 = vpop.eup %1852  ;;  %v1603_v53 = vand.u32 2147483648, %v3216_v19  ;;  %1856 = vrcp.f32 %v3238_v62 }
 0x3b1   : > { %v1551_v57 = vadd.f32 %v1845_v24, %v1550_v44  ;;  %v1610_v38 = vmul.f32 %v1849_v47, %v1609_v63  ;;  %v1563_v3 = vmul.f32 %v3250_v17, %v3214_v61  ;;  %vm1568_vm10 = vweird.f32 %v3250_v17 }
 0x3b2   : > { %v1581_v33 = vadd.f32 %v1847_v55, %v1580_v18  ;;  %v1640_v16 = vmul.f32 %v1851_v5, %v1639_v37  ;;  %v1855_v58 = vpop.eup %1854  ;;  %vm3269_vm1 = vcmp.eq.f32.partialorder %v1571_v34, 8.507059e+37  ;;  %vm1597_vm11 = vweird.f32 %v3216_v19 }
 0x3b3   : > { %v1555_v11 = vsel %vm1554_vm6, %v1845_v24, %v1551_v57  ;;  %v1611_v12 = vadd.f32 %v1849_v47, %v1610_v38  ;;  %v1601_v31 = vand.u32 2147483647, %v3216_v19  ;;  %v1564_v4 = vsub.f32 1.0, %v1563_v3  ;;  %v1860_v24 = vld [vmem:[%s1956_s18] sm:$0xff] }
 0x3b4   : > { %v1560_v52 = vsel %vm3219_vm12, %v1559_v59, %v1555_v11  ;;  %v1585_v7 = vsel %vm1584_vm8, %v1847_v55, %v1581_v33  ;;  %v1641_v6 = vadd.f32 %v1851_v5, %v1640_v16  ;;  %vm1644_vm12 = vmor %vm1642_vm0, %vm1643_vm5  ;;  %v1593_v43 = vmul.f32 %v1855_v58, %v3216_v19  ;;  %v1865_v11 = vld [vmem:[%s1956_s18 + $0x18] sm:$0xff] }
 0x3b5   : > { %v1590_v42 = vsel %vm3227_vm14, %v1589_v29, %v1585_v7  ;;  %v1615_v21 = vsel %vm1614_vm9, %v1849_v47, %v1611_v12  ;;  %v1667_v30 = vmul.f32 %v1560_v52, %v3088_v0  ;;  %v1604_v55 = vor.u32 1.1754944e-38, %v1603_v53  ;;  %vm1569_vm14 = vmor %vm1567_vm7, %vm1568_vm10  ;;  %v1866_v52 = vld [vmem:[%s1956_s18 + $0x28] sm:$0xff] }
 0x3b6   : > { %v1620_v15 = vsel %vm3233_vm15, %v1619_v51, %v1615_v21  ;;  %v1669_v13 = vmul.f32 %v1590_v42, %v3083_v23  ;;  %v1645_v2 = vsel %vm1644_vm12, %v1851_v5, %v1641_v6  ;;  %v1857_v0 = vpop.eup %1856  ;;  %v1565_v22 = vmul.f32 %v3250_v17, %v1564_v4 }
 0x3b7   : > { %v1671_v46 = vmul.f32 %v1620_v15, %v3090_v36  ;;  %v1675_v59 = vadd.f32 %v1860_v24, %v1667_v30  ;;  %v1650_v23 = vsel %vm3245_vm2, %v1649_v8, %v1645_v2  ;;  %v1594_v36 = vsub.f32 1.0, %v1593_v43 }
 0x3b8   : > { %v1677_v49 = vadd.f32 %v1861_v40, %v1669_v13  ;;  %v1673_v27 = vmul.f32 %v1650_v23, %v3101_v10  ;;  %v1623_v28 = vmul.f32 %v1857_v0, %v3238_v62  ;;  %v1566_v51 = vadd.f32 %v3250_v17, %v1565_v22  ;;  %v1867_v13 = vld [vmem:[%s1956_s18 + $0x38] sm:$0xff] }
 0x3b9   : > { %v1679_v47 = vadd.f32 %v1862_v60, %v1671_v46  ;;  %v1683_v45 = vmax.f32 %v1675_v59, 0.0  ;;  %v1595_v9 = vmul.f32 %v1855_v58, %v1594_v36  ;;  %vm1598_vm13 = vweird.f32 %v1855_v58 }
 0x3ba   : > { %v1685_v29 = vmax.f32 %v1677_v49, 0.0  ;;  %v1681_v35 = vadd.f32 %v1863_v56, %v1673_v27  ;;  %v1624_v10 = vsub.f32 1.0, %v1623_v28  ;;  %vm1628_vm15 = vweird.f32 %v1857_v0  ;;  %vm1599_vm0 = vmor %vm1597_vm11, %vm1598_vm13 }
 0x3bb   : > { %v1687_v5 = vmax.f32 %v1679_v47, 0.0  ;;  %1691 = vst [vmem:[%s3292_s21] sm:$0xff] %v1683_v45  ;;  %v1570_v25 = vsel %vm1569_vm14, %v3250_v17, %v1566_v51  ;;  %v1596_v54 = vadd.f32 %v1855_v58, %v1595_v9  ;;  %v1633_v44 = vand.u32 2147483648, %v3238_v62  ;;  %v1864_v17 = vld [vmem:[%s1956_s18 + $0x8] sm:$0xff] }
 0x3bc   : > { %1693 = vst [vmem:[%s3292_s21 + $0x10] sm:$0xff] %v1685_v29  ;;  %1858 = vrcp.f32 %v3240_v1  ;;  %v1689_v63 = vmax.f32 %v1681_v35, 0.0  ;;  %v1575_v48 = vsel %vm3269_vm1, %v1574_v20, %v1570_v25  ;;  %v1625_v61 = vmul.f32 %v1857_v0, %v1624_v10 }
 0x3bd   : > { %1695 = vst [vmem:[%s3292_s21 + $0x20] sm:$0xff] %v1687_v5  ;;  %v1631_v32 = vand.u32 2147483647, %v3238_v62  ;;  %v1600_v8 = vsel %vm1599_vm0, %v1855_v58, %v1596_v54  ;;  %vm1602_vm2 = vcmp.eq.f32.partialorder %v1601_v31, 8.507059e+37  ;;  %vm1627_vm3 = vweird.f32 %v3238_v62 }
 0x3be   : > { %1697 = vst [vmem:[%s3292_s21 + $0x30] sm:$0xff] %v1689_v63  ;;  %v1605_v18 = vsel %vm1602_vm2, %v1604_v55, %v1600_v8  ;;  %v1626_v34 = vadd.f32 %v1857_v0, %v1625_v61  ;;  %v1668_v57 = vmul.f32 %v1575_v48, %v3096_v14  ;;  %vm1629_vm4 = vmor %vm1627_vm3, %vm1628_vm15  ;;  %v1634_v38 = vor.u32 1.1754944e-38, %v1633_v44 }
 0x3bf   : > { %v1670_v19 = vmul.f32 %v1605_v18, %v3092_v26  ;;  %vm1632_vm5 = vcmp.eq.f32.partialorder %v1631_v32, 8.507059e+37  ;;  %v1663_v7 = vand.u32 2147483648, %v3240_v1  ;;  %v1661_v31 = vand.u32 2147483647, %v3240_v1 }
 0x3c0   : > { %v1630_v37 = vsel %vm1629_vm4, %v1857_v0, %v1626_v34  ;;  %v1676_v33 = vadd.f32 %v1864_v17, %v1668_v57  ;;  %vm1657_vm7 = vweird.f32 %v3240_v1 }
 0x3c1   : > { %v1635_v53 = vsel %vm1632_vm5, %v1634_v38, %v1630_v37  ;;  %v1678_v12 = vadd.f32 %v1865_v11, %v1670_v19  ;;  %vm1662_vm9 = vcmp.eq.f32.partialorder %v1661_v31, 8.507059e+37 }
 0x3c2   : > { %v1859_v20 = vpop.eup %1858  ;;  %v1672_v14 = vmul.f32 %v1635_v53, %v3098_v50  ;;  %v1684_v16 = vmax.f32 %v1676_v33, 0.0  ;;  %v1664_v50 = vor.u32 1.1754944e-38, %v1663_v7 }
 0x3c3   : > { %v1653_v62 = vmul.f32 %v1859_v20, %v3240_v1  ;;  %v1686_v3 = vmax.f32 %v1678_v12, 0.0  ;;  %vm1658_vm6 = vweird.f32 %v1859_v20 }
 0x3c4   : > { %v1680_v26 = vadd.f32 %v1866_v52, %v1672_v14  ;;  %1692 = vst [vmem:[%s3292_s21 + $0x8] sm:$0xff] %v1684_v16  ;;  %vm1659_vm8 = vmor %vm1657_vm7, %vm1658_vm6 }
 0x3c5   : > { %v1654_v58 = vsub.f32 1.0, %v1653_v62  ;;  %1694 = vst [vmem:[%s3292_s21 + $0x18] sm:$0xff] %v1686_v3 }
 0x3c6   : > { %v1688_v42 = vmax.f32 %v1680_v26, 0.0 }
 0x3c7   : > { %v1655_v41 = vmul.f32 %v1859_v20, %v1654_v58 }
 0x3c8   : > { %1696 = vst [vmem:[%s3292_s21 + $0x28] sm:$0xff] %v1688_v42 }
 0x3c9   : > { %v1656_v21 = vadd.f32 %v1859_v20, %v1655_v41 }
 0x3cb   : > { %v1660_v6 = vsel %vm1659_vm8, %v1859_v20, %v1656_v21 }
 0x3cc   : > { %v1665_v30 = vsel %vm1662_vm9, %v1664_v50, %v1660_v6 }
 0x3cd   : > { %v1674_v15 = vmul.f32 %v1665_v30, %v3107_v39 }
 0x3cf   : > { %v1682_v4 = vadd.f32 %v1867_v13, %v1674_v15 }
 0x3d1   : > { %v1690_v43 = vmax.f32 %v1682_v4, 0.0 }
 0x3d3   : > { %1698 = vst [vmem:[%s3292_s21 + $0x38] sm:$0xff] %v1690_v43 }
 0x3d4 PF: > { %s20_s13 = sadd.s32 1, %s1874_s13  }
 0x3d5   : > { %p17_p4 = scmp.ge.s32.totalorder %s20_s13, 4  }
 0x3d7   :  { %19 = sbr.rel (!%p17_p4) target bundleno = 1 (0x1), region = 101 }

</bundles_post_ra>
